<compile_context>
chip_gen: v5e
topology: v5e:2x2
jax: 0.10.0
libtpu: 0.0.40
codegen_flags: <defaults>
</compile_context>

<pallas_src>
import numpy as np
import jax
import jax.numpy as jnp
from jax.experimental import pallas as pl
from jax.experimental.pallas import tpu as pltpu


_VMEM = pl.BlockSpec(memory_space=pltpu.MemorySpace.VMEM)


# ----------------------------------------------------------------------------
# Single fused kernel:
#   Conv3x3(p=1)+bias+ReLU -> MaxPool2 -> Flatten -> FC1+tanh -> FC2
# ----------------------------------------------------------------------------
def _fused_forward_kernel(x_ref, wk_ref, bc_ref, w1_ref, b1_ref, w2_ref, b2_ref,
                          o_ref, xp_ref, ft_ref):
    N, C_in, H, W = x_ref.shape
    KH = wk_ref.shape[0]                  # 3
    CIW = C_in * W                        # 64  : lane-packed (ci, w)
    CW = wk_ref.shape[2]                  # 128 : W * C_out, parity-major in w
    NH = N * H
    HP, HALF = H // 2, CW // 2            # HALF = WP * C_out = 64
    OFF = (xp_ref.shape[1] - H) // 2      # 8 : sublane-aligned zero-pad band
    PAD = (KH - 1) // 2                   # 1

    # ---- Lane-dense, height-zero-padded activation staging ------------------
    #   xp[n, OFF + h, ci*W + w] = x[n, ci, h, w]
    # Only the pad bands are zeroed; the data rows are fully overwritten below.
    xp_ref[:, :OFF, :] = jnp.zeros((N, OFF, CIW), xp_ref.dtype)
    xp_ref[:, OFF + H:, :] = jnp.zeros((N, OFF, CIW), xp_ref.dtype)
    xv = x_ref[...]
    for ci in range(C_in):                # 4 aligned-row, lane-offset stores
        xp_ref[:, OFF:OFF + H, ci * W:(ci + 1) * W] = xv[:, ci]

    # ---- Conv2d(3x3, stride 1, pad 1) + bias + ReLU --------------------------
    # C_in and the kw taps (width Toeplitz + width zero-padding) are folded into
    # K=64; one matmul per height tap, accumulator initialized from the bias.
    acc = jnp.broadcast_to(bc_ref[...], (NH, CW))
    for kh in range(KH):
        start = OFF - PAD + kh
        a_kh = xp_ref[:, start:start + H, :].reshape(NH, CIW)     # [NH, 64]
        acc = acc + jnp.dot(a_kh, wk_ref[kh],
                            preferred_element_type=jnp.float32)   # [NH, 128]
    acc = jnp.maximum(acc, 0.0)                                    # ReLU

    # ---- MaxPool2d(2), width direction ---------------------------------------
    # Parity-major conv columns -> the w-pair max is two contiguous 64-lane halves.
    pw = jnp.maximum(acc[:, :HALF], acc[:, HALF:]).reshape(N, H, HALF)

    # ---- MaxPool height direction + flatten -----------------------------------
    # Pack the HP pooled rows along lanes into a [N, 512] feature buffer; the
    # NCHW flatten permutation is pre-folded into w1, so no transpose is needed.
    for hp in range(HP):
        ft_ref[:, hp * HALF:(hp + 1) * HALF] = jnp.maximum(
            pw[:, 2 * hp, :], pw[:, 2 * hp + 1, :])

    # ---- Linear(512->32) + Tanh  ->  Linear(32->10) ---------------------------
    y1 = jnp.tanh(jnp.dot(ft_ref[...], w1_ref[...],
                          preferred_element_type=jnp.float32) + b1_ref[...])
    y2 = jnp.dot(y1, w2_ref[...], preferred_element_type=jnp.float32) + b2_ref[...]
    o_ref[...] = y2.astype(o_ref.dtype)


def neural_network_forward(x, params):
    """x: [N, C_in, H, W] (NCHW, exactly as PyTorch). Single fused pallas_call."""
    N, C_in, H, W = x.shape
    wk, bc = params["wk"], params["bc"]
    w1, b1 = params["w1"], params["b1"]
    w2, b2 = params["w2"], params["b2"]
    KH, KCI, CW = wk.shape
    C_out = CW // W
    F1, H1 = w1.shape
    H2 = w2.shape[1]

    # Static shape/dtype assumptions baked into the fused kernel: fail loudly.
    assert x.dtype == jnp.float32, x.dtype
    assert KH % 2 == 1 and KCI == C_in * W, (wk.shape, C_in, W)
    assert H % 2 == 0 and W % 2 == 0, (H, W)
    assert CW == W * C_out and bc.shape == (1, CW), (bc.shape, CW)
    assert F1 == (H // 2) * (W // 2) * C_out, (F1, H, W, C_out)
    assert b1.shape == (1, H1) and w2.shape == (H1, H2) and b2.shape == (1, H2)

    pad_rows = 8                              # sublane-aligned zero-pad band
    assert pad_rows >= (KH - 1) // 2

    return pl.pallas_call(
        _fused_forward_kernel,
        out_shape=jax.ShapeDtypeStruct((N, H2), jnp.float32),
        in_specs=[_VMEM] * 7,
        out_specs=_VMEM,
        scratch_shapes=[
            pltpu.VMEM((N, H + 2 * pad_rows, C_in * W), jnp.float32),  # xp
            pltpu.VMEM((N, F1), jnp.float32),                          # feat
        ],
    )(x, wk, bc, w1, b1, w2, b2)


# ----------------------------------------------------------------------------
# One-time parameter repacking (outside jit): torch layouts -> kernel layouts
# ----------------------------------------------------------------------------
def prepare_params(tp, H=16, W=16):
    conv_w = np.asarray(tp["conv_w"], np.float32)   # [C_out, C_in, KH, KW]
    conv_b = np.asarray(tp["conv_b"], np.float32)
    fc1_w = np.asarray(tp["fc1_w"], np.float32)     # [H1, C_out*HP*WP]
    fc1_b = np.asarray(tp["fc1_b"], np.float32)
    fc2_w = np.asarray(tp["fc2_w"], np.float32)     # [H2, H1]
    fc2_b = np.asarray(tp["fc2_b"], np.float32)
    C_out, C_in, KH, KW = conv_w.shape
    HP, WP = H // 2, W // 2
    CW = W * C_out
    PADW = (KW - 1) // 2

    def col(wo, co):                      # parity-major conv output column
        return (wo % 2) * (WP * C_out) + (wo // 2) * C_out + co

    # K-folded width-Toeplitz conv weight:
    #   wk[kh, ci*W + wi, col(wo, co)] = conv_w[co, ci, kh, wi - wo + PADW]
    wk = np.zeros((KH, C_in * W, CW), np.float32)
    for kh in range(KH):
        for ci in range(C_in):
            for wi in range(W):
                for wo in range(W):
                    kw = wi - wo + PADW
                    if 0 <= kw < KW:
                        for co in range(C_out):
                            wk[kh, ci * W + wi, col(wo, co)] = conv_w[co, ci, kh, kw]

    bc = np.zeros((1, CW), np.float32)
    for wo in range(W):
        for co in range(C_out):
            bc[0, col(wo, co)] = conv_b[co]

    # fc1 repack: fold the NCHW flatten order (co*HP*WP + hp*WP + wp) into the
    # kernel's pooled-feature lane order (hp*WP*C_out + wp*C_out + co).
    H1 = fc1_w.shape[0]
    w1 = (fc1_w.reshape(H1, C_out, HP, WP)
                .transpose(2, 3, 1, 0)             # [HP, WP, C_out, H1]
                .reshape(HP * WP * C_out, H1))

    return {
        "wk": jnp.asarray(wk),
        "bc": jnp.asarray(bc),
        "w1": jnp.asarray(np.ascontiguousarray(w1)),
        "b1": jnp.asarray(fc1_b.reshape(1, -1)),
        "w2": jnp.asarray(np.ascontiguousarray(fc2_w.T)),
        "b2": jnp.asarray(fc2_b.reshape(1, -1)),
    }


def init_torch_params(key):
    """Parameters in the exact layouts PyTorch holds them."""
    k1, k2, k3, k4, k5, k6 = jax.random.split(key, 6)
    C_in, C_out, K = 4, 8, 3
    F_flat, H1, H2 = 8 * 8 * 8, 32, 10
    return {
        "conv_w": 0.1 * jax.random.normal(k1, (C_out, C_in, K, K), jnp.float32),
        "conv_b": 0.1 * jax.random.normal(k2, (C_out,), jnp.float32),
        "fc1_w": 0.05 * jax.random.normal(k3, (H1, F_flat), jnp.float32),
        "fc1_b": 0.05 * jax.random.normal(k4, (H1,), jnp.float32),
        "fc2_w": 0.1 * jax.random.normal(k5, (H2, H1), jnp.float32),
        "fc2_b": 0.1 * jax.random.normal(k6, (H2,), jnp.float32),
    }


# ----------------------------------------------------------------------------
# Pure-JAX reference of the PyTorch forward (for correctness check only)
# ----------------------------------------------------------------------------
def reference_forward(x, tp):
    y = jax.lax.conv_general_dilated(
        x, tp["conv_w"], window_strides=(1, 1), padding=((1, 1), (1, 1)),
        dimension_numbers=("NCHW", "OIHW", "NCHW"))
    y = y + tp["conv_b"].reshape(1, -1, 1, 1)
    y = jnp.maximum(y, 0.0)
    y = jax.lax.reduce_window(y, -jnp.inf, jax.lax.max,
                              (1, 1, 2, 2), (1, 1, 2, 2), "VALID")
    y = y.reshape(y.shape[0], -1)                      # torch.nn.Flatten on NCHW
    y = jnp.tanh(y @ tp["fc1_w"].T + tp["fc1_b"])
    return y @ tp["fc2_w"].T + tp["fc2_b"]


if __name__ == "__main__":
    jax.config.update("jax_default_matmul_precision", "highest")

    key = jax.random.PRNGKey(0)
    kx, kp = jax.random.split(key)
    x = jax.random.normal(kx, (2, 4, 16, 16), jnp.float32)   # NCHW, as PyTorch
    torch_params = init_torch_params(kp)
    params = prepare_params(torch_params)                    # one-time repack

    fwd = jax.jit(neural_network_forward)
    out = jax.block_until_ready(fwd(x, params))
    assert out.shape == (2, 10), out.shape
    assert bool(jnp.all(jnp.isfinite(out)))

    ref = jax.block_until_ready(reference_forward(x, torch_params))
    max_err = float(jnp.max(jnp.abs(out - ref)))
    assert max_err < 1e-3, f"mismatch vs reference: max abs err = {max_err}"

    print("KERNEL_OK")
</pallas_src>

<mosaic_0001>
module attributes {stable_mosaic.version = 11 : i64} {
  func.func @_fused_forward_kernel(%arg0: memref<2x4x16x16xf32, #tpu.memory_space<vmem>>, %arg1: memref<3x64x128xf32, #tpu.memory_space<vmem>>, %arg2: memref<1x128xf32, #tpu.memory_space<vmem>>, %arg3: memref<512x32xf32, #tpu.memory_space<vmem>>, %arg4: memref<1x32xf32, #tpu.memory_space<vmem>>, %arg5: memref<32x10xf32, #tpu.memory_space<vmem>>, %arg6: memref<1x10xf32, #tpu.memory_space<vmem>>, %arg7: memref<2x10xf32, #tpu.memory_space<vmem>>, %arg8: memref<2x32x64xf32, #tpu.memory_space<vmem>>, %arg9: memref<2x512xf32, #tpu.memory_space<vmem>>) attributes {dimension_semantics = [], scalar_prefetch = 0 : i64, scratch_operands = 2 : i64, tpu.core_type = #tpu.core_type<tc>} {
    %cst = arith.constant 0.000000e+00 : f32
    %0 = vector.broadcast %cst : f32 to vector<2x8x64xf32>
    %c0 = arith.constant 0 : index
    %c0_0 = arith.constant 0 : index
    %c0_1 = arith.constant 0 : index
    %1 = vector.load %arg8[%c0, %c0_0, %c0_1] : memref<2x32x64xf32, #tpu.memory_space<vmem>>, vector<2x8x64xf32>
    tpu.vector_store %arg8[%c0, %c0_0, %c0_1], %0 {strides = array<i32>} : memref<2x32x64xf32, #tpu.memory_space<vmem>>, vector<2x8x64xf32>,
    %cst_2 = arith.constant 0.000000e+00 : f32
    %2 = vector.broadcast %cst_2 : f32 to vector<2x8x64xf32>
    %c0_3 = arith.constant 0 : index
    %c24 = arith.constant 24 : index
    %c0_4 = arith.constant 0 : index
    %3 = vector.load %arg8[%c0_3, %c24, %c0_4] : memref<2x32x64xf32, #tpu.memory_space<vmem>>, vector<2x8x64xf32>
    tpu.vector_store %arg8[%c0_3, %c24, %c0_4], %2 {strides = array<i32>} : memref<2x32x64xf32, #tpu.memory_space<vmem>>, vector<2x8x64xf32>,
    %c0_5 = arith.constant 0 : index
    %c0_6 = arith.constant 0 : index
    %c0_7 = arith.constant 0 : index
    %c0_8 = arith.constant 0 : index
    %4 = vector.load %arg0[%c0_5, %c0_6, %c0_7, %c0_8] : memref<2x4x16x16xf32, #tpu.memory_space<vmem>>, vector<2x4x16x16xf32>
    %5 = vector.extract_strided_slice %4 {offsets = [0, 0, 0, 0], sizes = [2, 1, 16, 16], strides = [1, 1, 1, 1]} : vector<2x4x16x16xf32> to vector<2x1x16x16xf32>
    %6 = vector.shape_cast %5 : vector<2x1x16x16xf32> to vector<2x16x16xf32>
    %c0_9 = arith.constant 0 : index
    %c8 = arith.constant 8 : index
    %c0_10 = arith.constant 0 : index
    %7 = vector.load %arg8[%c0_9, %c8, %c0_10] : memref<2x32x64xf32, #tpu.memory_space<vmem>>, vector<2x16x16xf32>
    tpu.vector_store %arg8[%c0_9, %c8, %c0_10], %6 {strides = array<i32>} : memref<2x32x64xf32, #tpu.memory_space<vmem>>, vector<2x16x16xf32>,
    %8 = vector.extract_strided_slice %4 {offsets = [0, 1, 0, 0], sizes = [2, 1, 16, 16], strides = [1, 1, 1, 1]} : vector<2x4x16x16xf32> to vector<2x1x16x16xf32>
    %9 = vector.shape_cast %8 : vector<2x1x16x16xf32> to vector<2x16x16xf32>
    %c0_11 = arith.constant 0 : index
    %c8_12 = arith.constant 8 : index
    %c16 = arith.constant 16 : index
    %10 = vector.load %arg8[%c0_11, %c8_12, %c16] : memref<2x32x64xf32, #tpu.memory_space<vmem>>, vector<2x16x16xf32>
    tpu.vector_store %arg8[%c0_11, %c8_12, %c16], %9 {strides = array<i32>} : memref<2x32x64xf32, #tpu.memory_space<vmem>>, vector<2x16x16xf32>,
    %11 = vector.extract_strided_slice %4 {offsets = [0, 2, 0, 0], sizes = [2, 1, 16, 16], strides = [1, 1, 1, 1]} : vector<2x4x16x16xf32> to vector<2x1x16x16xf32>
    %12 = vector.shape_cast %11 : vector<2x1x16x16xf32> to vector<2x16x16xf32>
    %c0_13 = arith.constant 0 : index
    %c8_14 = arith.constant 8 : index
    %c32 = arith.constant 32 : index
    %13 = vector.load %arg8[%c0_13, %c8_14, %c32] : memref<2x32x64xf32, #tpu.memory_space<vmem>>, vector<2x16x16xf32>
    tpu.vector_store %arg8[%c0_13, %c8_14, %c32], %12 {strides = array<i32>} : memref<2x32x64xf32, #tpu.memory_space<vmem>>, vector<2x16x16xf32>,
    %14 = vector.extract_strided_slice %4 {offsets = [0, 3, 0, 0], sizes = [2, 1, 16, 16], strides = [1, 1, 1, 1]} : vector<2x4x16x16xf32> to vector<2x1x16x16xf32>
    %15 = vector.shape_cast %14 : vector<2x1x16x16xf32> to vector<2x16x16xf32>
    %c0_15 = arith.constant 0 : index
    %c8_16 = arith.constant 8 : index
    %c48 = arith.constant 48 : index
    %16 = vector.load %arg8[%c0_15, %c8_16, %c48] : memref<2x32x64xf32, #tpu.memory_space<vmem>>, vector<2x16x16xf32>
    tpu.vector_store %arg8[%c0_15, %c8_16, %c48], %15 {strides = array<i32>} : memref<2x32x64xf32, #tpu.memory_space<vmem>>, vector<2x16x16xf32>,
    %c0_17 = arith.constant 0 : index
    %c0_18 = arith.constant 0 : index
    %17 = vector.load %arg2[%c0_17, %c0_18] : memref<1x128xf32, #tpu.memory_space<vmem>>, vector<1x128xf32>
    %18 = vector.shape_cast %17 : vector<1x128xf32> to vector<1x128xf32>
    %19 = vector.broadcast %18 : vector<1x128xf32> to vector<32x128xf32>
    %c0_19 = arith.constant 0 : index
    %c7 = arith.constant 7 : index
    %c0_20 = arith.constant 0 : index
    %20 = vector.load %arg8[%c0_19, %c7, %c0_20] : memref<2x32x64xf32, #tpu.memory_space<vmem>>, vector<2x16x64xf32>
    %21 = vector.shape_cast %20 : vector<2x16x64xf32> to vector<32x64xf32>
    %c0_21 = arith.constant 0 : index
    %c0_22 = arith.constant 0 : index
    %c0_23 = arith.constant 0 : index
    %22 = vector.load %arg1[%c0_21, %c0_22, %c0_23] : memref<3x64x128xf32, #tpu.memory_space<vmem>>, vector<1x64x128xf32>
    %23 = vector.shape_cast %22 : vector<1x64x128xf32> to vector<64x128xf32>
    %cst_24 = arith.constant dense<0.000000e+00> : vector<32x128xf32>
    %24 = tpu.matmul %21, %23, %cst_24 {dimension_numbers = #tpu.dot_dimension_numbers<[1], [0], [0], [1], [0, 0, 1, 1], [], []>, precision = #tpu.contract_precision<fp32>} : vector<32x64xf32>, vector<64x128xf32>, vector<32x128xf32> -> vector<32x128xf32>
    %25 = arith.addf %19, %24 : vector<32x128xf32>
    %c0_25 = arith.constant 0 : index
    %c8_26 = arith.constant 8 : index
    %c0_27 = arith.constant 0 : index
    %26 = vector.load %arg8[%c0_25, %c8_26, %c0_27] : memref<2x32x64xf32, #tpu.memory_space<vmem>>, vector<2x16x64xf32>
    %27 = vector.shape_cast %26 : vector<2x16x64xf32> to vector<32x64xf32>
    %c1 = arith.constant 1 : index
    %c0_28 = arith.constant 0 : index
    %c0_29 = arith.constant 0 : index
    %28 = vector.load %arg1[%c1, %c0_28, %c0_29] : memref<3x64x128xf32, #tpu.memory_space<vmem>>, vector<1x64x128xf32>
    %29 = vector.shape_cast %28 : vector<1x64x128xf32> to vector<64x128xf32>
    %cst_30 = arith.constant dense<0.000000e+00> : vector<32x128xf32>
    %30 = tpu.matmul %27, %29, %cst_30 {dimension_numbers = #tpu.dot_dimension_numbers<[1], [0], [0], [1], [0, 0, 1, 1], [], []>, precision = #tpu.contract_precision<fp32>} : vector<32x64xf32>, vector<64x128xf32>, vector<32x128xf32> -> vector<32x128xf32>
    %31 = arith.addf %25, %30 : vector<32x128xf32>
    %c0_31 = arith.constant 0 : index
    %c9 = arith.constant 9 : index
    %c0_32 = arith.constant 0 : index
    %32 = vector.load %arg8[%c0_31, %c9, %c0_32] : memref<2x32x64xf32, #tpu.memory_space<vmem>>, vector<2x16x64xf32>
    %33 = vector.shape_cast %32 : vector<2x16x64xf32> to vector<32x64xf32>
    %c2 = arith.constant 2 : index
    %c0_33 = arith.constant 0 : index
    %c0_34 = arith.constant 0 : index
    %34 = vector.load %arg1[%c2, %c0_33, %c0_34] : memref<3x64x128xf32, #tpu.memory_space<vmem>>, vector<1x64x128xf32>
    %35 = vector.shape_cast %34 : vector<1x64x128xf32> to vector<64x128xf32>
    %cst_35 = arith.constant dense<0.000000e+00> : vector<32x128xf32>
    %36 = tpu.matmul %33, %35, %cst_35 {dimension_numbers = #tpu.dot_dimension_numbers<[1], [0], [0], [1], [0, 0, 1, 1], [], []>, precision = #tpu.contract_precision<fp32>} : vector<32x64xf32>, vector<64x128xf32>, vector<32x128xf32> -> vector<32x128xf32>
    %37 = arith.addf %31, %36 : vector<32x128xf32>
    %cst_36 = arith.constant 0.000000e+00 : f32
    %38 = vector.broadcast %cst_36 : f32 to vector<32x128xf32>
    %39 = arith.maximumf %37, %38 : vector<32x128xf32>
    %40 = vector.extract_strided_slice %39 {offsets = [0, 0], sizes = [32, 64], strides = [1, 1]} : vector<32x128xf32> to vector<32x64xf32>
    %41 = vector.extract_strided_slice %39 {offsets = [0, 64], sizes = [32, 64], strides = [1, 1]} : vector<32x128xf32> to vector<32x64xf32>
    %42 = arith.maximumf %40, %41 : vector<32x64xf32>
    %43 = vector.shape_cast %42 : vector<32x64xf32> to vector<2x16x64xf32>
    %44 = vector.extract_strided_slice %43 {offsets = [0, 0, 0], sizes = [2, 1, 64], strides = [1, 1, 1]} : vector<2x16x64xf32> to vector<2x1x64xf32>
    %45 = vector.shape_cast %44 : vector<2x1x64xf32> to vector<2x64xf32>
    %46 = vector.extract_strided_slice %43 {offsets = [0, 1, 0], sizes = [2, 1, 64], strides = [1, 1, 1]} : vector<2x16x64xf32> to vector<2x1x64xf32>
    %47 = vector.shape_cast %46 : vector<2x1x64xf32> to vector<2x64xf32>
    %48 = arith.maximumf %45, %47 : vector<2x64xf32>
    %c0_37 = arith.constant 0 : index
    %c0_38 = arith.constant 0 : index
    %49 = vector.load %arg9[%c0_37, %c0_38] : memref<2x512xf32, #tpu.memory_space<vmem>>, vector<2x64xf32>
    tpu.vector_store %arg9[%c0_37, %c0_38], %48 {strides = array<i32>} : memref<2x512xf32, #tpu.memory_space<vmem>>, vector<2x64xf32>,
    %50 = vector.extract_strided_slice %43 {offsets = [0, 2, 0], sizes = [2, 1, 64], strides = [1, 1, 1]} : vector<2x16x64xf32> to vector<2x1x64xf32>
    %51 = vector.shape_cast %50 : vector<2x1x64xf32> to vector<2x64xf32>
    %52 = vector.extract_strided_slice %43 {offsets = [0, 3, 0], sizes = [2, 1, 64], strides = [1, 1, 1]} : vector<2x16x64xf32> to vector<2x1x64xf32>
    %53 = vector.shape_cast %52 : vector<2x1x64xf32> to vector<2x64xf32>
    %54 = arith.maximumf %51, %53 : vector<2x64xf32>
    %c0_39 = arith.constant 0 : index
    %c64 = arith.constant 64 : index
    %55 = vector.load %arg9[%c0_39, %c64] : memref<2x512xf32, #tpu.memory_space<vmem>>, vector<2x64xf32>
    tpu.vector_store %arg9[%c0_39, %c64], %54 {strides = array<i32>} : memref<2x512xf32, #tpu.memory_space<vmem>>, vector<2x64xf32>,
    %56 = vector.extract_strided_slice %43 {offsets = [0, 4, 0], sizes = [2, 1, 64], strides = [1, 1, 1]} : vector<2x16x64xf32> to vector<2x1x64xf32>
    %57 = vector.shape_cast %56 : vector<2x1x64xf32> to vector<2x64xf32>
    %58 = vector.extract_strided_slice %43 {offsets = [0, 5, 0], sizes = [2, 1, 64], strides = [1, 1, 1]} : vector<2x16x64xf32> to vector<2x1x64xf32>
    %59 = vector.shape_cast %58 : vector<2x1x64xf32> to vector<2x64xf32>
    %60 = arith.maximumf %57, %59 : vector<2x64xf32>
    %c0_40 = arith.constant 0 : index
    %c128 = arith.constant 128 : index
    %61 = vector.load %arg9[%c0_40, %c128] : memref<2x512xf32, #tpu.memory_space<vmem>>, vector<2x64xf32>
    tpu.vector_store %arg9[%c0_40, %c128], %60 {strides = array<i32>} : memref<2x512xf32, #tpu.memory_space<vmem>>, vector<2x64xf32>,
    %62 = vector.extract_strided_slice %43 {offsets = [0, 6, 0], sizes = [2, 1, 64], strides = [1, 1, 1]} : vector<2x16x64xf32> to vector<2x1x64xf32>
    %63 = vector.shape_cast %62 : vector<2x1x64xf32> to vector<2x64xf32>
    %64 = vector.extract_strided_slice %43 {offsets = [0, 7, 0], sizes = [2, 1, 64], strides = [1, 1, 1]} : vector<2x16x64xf32> to vector<2x1x64xf32>
    %65 = vector.shape_cast %64 : vector<2x1x64xf32> to vector<2x64xf32>
    %66 = arith.maximumf %63, %65 : vector<2x64xf32>
    %c0_41 = arith.constant 0 : index
    %c192 = arith.constant 192 : index
    %67 = vector.load %arg9[%c0_41, %c192] : memref<2x512xf32, #tpu.memory_space<vmem>>, vector<2x64xf32>
    tpu.vector_store %arg9[%c0_41, %c192], %66 {strides = array<i32>} : memref<2x512xf32, #tpu.memory_space<vmem>>, vector<2x64xf32>,
    %68 = vector.extract_strided_slice %43 {offsets = [0, 8, 0], sizes = [2, 1, 64], strides = [1, 1, 1]} : vector<2x16x64xf32> to vector<2x1x64xf32>
    %69 = vector.shape_cast %68 : vector<2x1x64xf32> to vector<2x64xf32>
    %70 = vector.extract_strided_slice %43 {offsets = [0, 9, 0], sizes = [2, 1, 64], strides = [1, 1, 1]} : vector<2x16x64xf32> to vector<2x1x64xf32>
    %71 = vector.shape_cast %70 : vector<2x1x64xf32> to vector<2x64xf32>
    %72 = arith.maximumf %69, %71 : vector<2x64xf32>
    %c0_42 = arith.constant 0 : index
    %c256 = arith.constant 256 : index
    %73 = vector.load %arg9[%c0_42, %c256] : memref<2x512xf32, #tpu.memory_space<vmem>>, vector<2x64xf32>
    tpu.vector_store %arg9[%c0_42, %c256], %72 {strides = array<i32>} : memref<2x512xf32, #tpu.memory_space<vmem>>, vector<2x64xf32>,
    %74 = vector.extract_strided_slice %43 {offsets = [0, 10, 0], sizes = [2, 1, 64], strides = [1, 1, 1]} : vector<2x16x64xf32> to vector<2x1x64xf32>
    %75 = vector.shape_cast %74 : vector<2x1x64xf32> to vector<2x64xf32>
    %76 = vector.extract_strided_slice %43 {offsets = [0, 11, 0], sizes = [2, 1, 64], strides = [1, 1, 1]} : vector<2x16x64xf32> to vector<2x1x64xf32>
    %77 = vector.shape_cast %76 : vector<2x1x64xf32> to vector<2x64xf32>
    %78 = arith.maximumf %75, %77 : vector<2x64xf32>
    %c0_43 = arith.constant 0 : index
    %c320 = arith.constant 320 : index
    %79 = vector.load %arg9[%c0_43, %c320] : memref<2x512xf32, #tpu.memory_space<vmem>>, vector<2x64xf32>
    tpu.vector_store %arg9[%c0_43, %c320], %78 {strides = array<i32>} : memref<2x512xf32, #tpu.memory_space<vmem>>, vector<2x64xf32>,
    %80 = vector.extract_strided_slice %43 {offsets = [0, 12, 0], sizes = [2, 1, 64], strides = [1, 1, 1]} : vector<2x16x64xf32> to vector<2x1x64xf32>
    %81 = vector.shape_cast %80 : vector<2x1x64xf32> to vector<2x64xf32>
    %82 = vector.extract_strided_slice %43 {offsets = [0, 13, 0], sizes = [2, 1, 64], strides = [1, 1, 1]} : vector<2x16x64xf32> to vector<2x1x64xf32>
    %83 = vector.shape_cast %82 : vector<2x1x64xf32> to vector<2x64xf32>
    %84 = arith.maximumf %81, %83 : vector<2x64xf32>
    %c0_44 = arith.constant 0 : index
    %c384 = arith.constant 384 : index
    %85 = vector.load %arg9[%c0_44, %c384] : memref<2x512xf32, #tpu.memory_space<vmem>>, vector<2x64xf32>
    tpu.vector_store %arg9[%c0_44, %c384], %84 {strides = array<i32>} : memref<2x512xf32, #tpu.memory_space<vmem>>, vector<2x64xf32>,
    %86 = vector.extract_strided_slice %43 {offsets = [0, 14, 0], sizes = [2, 1, 64], strides = [1, 1, 1]} : vector<2x16x64xf32> to vector<2x1x64xf32>
    %87 = vector.shape_cast %86 : vector<2x1x64xf32> to vector<2x64xf32>
    %88 = vector.extract_strided_slice %43 {offsets = [0, 15, 0], sizes = [2, 1, 64], strides = [1, 1, 1]} : vector<2x16x64xf32> to vector<2x1x64xf32>
    %89 = vector.shape_cast %88 : vector<2x1x64xf32> to vector<2x64xf32>
    %90 = arith.maximumf %87, %89 : vector<2x64xf32>
    %c0_45 = arith.constant 0 : index
    %c448 = arith.constant 448 : index
    %91 = vector.load %arg9[%c0_45, %c448] : memref<2x512xf32, #tpu.memory_space<vmem>>, vector<2x64xf32>
    tpu.vector_store %arg9[%c0_45, %c448], %90 {strides = array<i32>} : memref<2x512xf32, #tpu.memory_space<vmem>>, vector<2x64xf32>,
    %c0_46 = arith.constant 0 : index
    %c0_47 = arith.constant 0 : index
    %92 = vector.load %arg9[%c0_46, %c0_47] : memref<2x512xf32, #tpu.memory_space<vmem>>, vector<2x512xf32>
    %c0_48 = arith.constant 0 : index
    %c0_49 = arith.constant 0 : index
    %93 = vector.load %arg3[%c0_48, %c0_49] : memref<512x32xf32, #tpu.memory_space<vmem>>, vector<512x32xf32>
    %cst_50 = arith.constant dense<0.000000e+00> : vector<2x32xf32>
    %94 = tpu.matmul %92, %93, %cst_50 {dimension_numbers = #tpu.dot_dimension_numbers<[1], [0], [0], [1], [0, 0, 1, 1], [], []>, precision = #tpu.contract_precision<fp32>} : vector<2x512xf32>, vector<512x32xf32>, vector<2x32xf32> -> vector<2x32xf32>
    %c0_51 = arith.constant 0 : index
    %c0_52 = arith.constant 0 : index
    %95 = vector.load %arg4[%c0_51, %c0_52] : memref<1x32xf32, #tpu.memory_space<vmem>>, vector<1x32xf32>
    %96 = vector.broadcast %95 : vector<1x32xf32> to vector<2x32xf32>
    %97 = arith.addf %94, %96 : vector<2x32xf32>
    %98 = math.tanh %97 : vector<2x32xf32>
    %c0_53 = arith.constant 0 : index
    %c0_54 = arith.constant 0 : index
    %99 = vector.load %arg5[%c0_53, %c0_54] : memref<32x10xf32, #tpu.memory_space<vmem>>, vector<32x10xf32>
    %cst_55 = arith.constant dense<0.000000e+00> : vector<2x10xf32>
    %100 = tpu.matmul %98, %99, %cst_55 {dimension_numbers = #tpu.dot_dimension_numbers<[1], [0], [0], [1], [0, 0, 1, 1], [], []>, precision = #tpu.contract_precision<fp32>} : vector<2x32xf32>, vector<32x10xf32>, vector<2x10xf32> -> vector<2x10xf32>
    %c0_56 = arith.constant 0 : index
    %c0_57 = arith.constant 0 : index
    %101 = vector.load %arg6[%c0_56, %c0_57] : memref<1x10xf32, #tpu.memory_space<vmem>>, vector<1x10xf32>
    %102 = vector.broadcast %101 : vector<1x10xf32> to vector<2x10xf32>
    %103 = arith.addf %100, %102 : vector<2x10xf32>
    %c0_58 = arith.constant 0 : index
    %c0_59 = arith.constant 0 : index
    %104 = vector.load %arg7[%c0_58, %c0_59] : memref<2x10xf32, #tpu.memory_space<vmem>>, vector<2x10xf32>
    tpu.vector_store %arg7[%c0_58, %c0_59], %103 {strides = array<i32>} : memref<2x10xf32, #tpu.memory_space<vmem>>, vector<2x10xf32>,
    return
  }
}

</mosaic_0001>

<bundles_post_ra>
// kernel: neural_network_forward.1
= control target key start
LH: loop header
LB: loop body
LE: loop exit
PB: predicated region body
PF: predicated region fallthrough
CT: control target
= control target key end

     0   :  { %s3076_s28 = smov 48   ;;  %s3077_s29 = smov 16   ;;  %s4959_s0 = inlined_call_operand.vmem [shape: f32[2,4,16,16], index: 0, kind: input, shape index: {}]   ;;  %s4960_s1 = inlined_call_operand.vmem [shape: f32[3,64,128], index: 1, kind: input, shape index: {}]   ;;  %s4961_s2 = inlined_call_operand.vmem [shape: f32[1,128], index: 2, kind: input, shape index: {}]   ;;  %s4962_s3 = inlined_call_operand.vmem [shape: f32[512,32], index: 3, kind: input, shape index: {}]   ;;  %s4963_s4 = inlined_call_operand.vmem [shape: f32[1,32], index: 4, kind: input, shape index: {}]   ;;  %s4964_s5 = inlined_call_operand.vmem [shape: f32[32,10], index: 5, kind: input, shape index: {}]   ;;  %s4965_s6 = inlined_call_operand.vmem [shape: f32[1,10], index: 6, kind: input, shape index: {}]   ;;  %s4966_s7 = inlined_call_operand.hbm [shape: f32[2,10], index: 7, kind: output, shape index: {}]  }
   0x1   :  { %v38_v0 = vld [vmem:[%s4959_s0 + $0x30] sm:$0xff]  ;;  %v37_v2 = vld [vmem:[%s4959_s0 + $0x28] sm:$0xff]  ;;  %s3078_s9 = smov 32  }
   0x2   :  { %v34_v1 = vld [vmem:[%s4959_s0 + $0x10] sm:$0xff]  ;;  %99 = vrot.lane.b32.xlu1 %v38_v0, %s3076_s28  ;;  %80 = vrot.lane.b32.xlu2 %v37_v2, %s3078_s9 }
   0x3   :  { %57 = vrot.lane.b32.xlu0 %v34_v1, %s3077_s29 }
   0x4   :  { %12 = vsyncpa [#allocation5], 0  ;;  %v35_v3 = vld [vmem:[%s4959_s0 + $0x18] sm:$0xff]  ;;  %v36_v4 = vld [vmem:[%s4959_s0 + $0x20] sm:$0xff]  ;;  %vm48_vm0 = vcmask 130048   ;;  %vm27_vm1 = vcmask 523264  }
   0x5   :  { %v39_v5 = vld [vmem:[%s4959_s0 + $0x38] sm:$0xff]  ;;  %v42_v6 = vld [vmem:[%s4959_s0 + $0x50] sm:$0xff]  ;;  %v44_v7 = vld [vmem:[%s4959_s0 + $0x60] sm:$0xff]  ;;  %v3079_v51 = vmov 0.0   ;;  %vm69_vm2 = vcmask 261248   ;;  %vm90_vm3 = vcmask 392448  }
   0x6   :  { %v46_v8 = vld [vmem:[%s4959_s0 + $0x70] sm:$0xff]  ;;  %v43_v9 = vld [vmem:[%s4959_s0 + $0x58] sm:$0xff]  ;;  %v45_v10 = vld [vmem:[%s4959_s0 + $0x68] sm:$0xff]  ;;  %28 = vst.msk [vmem:[#allocation2] sm:$0xff] %vm27_vm1, %v3079_v51  ;;  %vm111_vm4 = vcmask 523648   ;;  %vm1235_vm5 = vcmask 1041409  }
   0x7   :  { %v47_v11 = vld [vmem:[%s4959_s0 + $0x78] sm:$0xff]  ;;  %v130_v14 = vld [vmem:[%s4960_s1 + $0x30] sm:$0xff]  ;;  %v32_v17 = vld [vmem:[%s4959_s0] sm:$0xff]  ;;  %29 = vst.msk [vmem:[#allocation2 + $0x20] sm:$0xff] %vm27_vm1, %v3079_v51  ;;  %vm1237_vm6 = vcmask 1043459   ;;  %vm1239_vm7 = vcmask 1045509  }
   0x8   :  { %v131_v12 = vld [vmem:[%s4960_s1 + $0x38] sm:$0xff]  ;;  %v3169_v16 = vand.u32 4294901760, %v130_v14  ;;  %49 = vst.msk [vmem:[#allocation2 + $0x8] sm:$0xff] %vm48_vm0, %v32_v17  ;;  %v129_v20 = vld [vmem:[%s4960_s1 + $0x28] sm:$0xff]  ;;  %v128_v24 = vld [vmem:[%s4960_s1 + $0x20] sm:$0xff]  ;;  %vm1241_vm8 = vcmask 1047559  }
   0x9   :  { %v3161_v13 = vand.u32 4294901760, %v131_v12  ;;  %v3191_v23 = vand.u32 4294901760, %v129_v20  ;;  %v3203_v28 = vand.u32 4294901760, %v128_v24  ;;  %v127_v29 = vld [vmem:[%s4960_s1 + $0x18] sm:$0xff]  ;;  %v33_v34 = vld [vmem:[%s4959_s0 + $0x8] sm:$0xff]  ;;  %v126_v35 = vld [vmem:[%s4960_s1 + $0x10] sm:$0xff] }
   0xa   :  { %59 = vrot.lane.b32.xlu1 %v35_v3, %s3077_s29  ;;  %101 = vrot.lane.b32.xlu2 %v39_v5, %s3076_s28  ;;  %v3179_v19 = vsub.f32 %v130_v14, %v3169_v16  ;;  %v3215_v33 = vand.u32 4294901760, %v127_v29  ;;  %50 = vst.msk [vmem:[#allocation2 + $0x10] sm:$0xff] %vm48_vm0, %v33_v34  ;;  %v3232_v39 = vand.u32 4294901760, %v126_v35  ;;  %v125_v40 = vld [vmem:[%s4960_s1 + $0x8] sm:$0xff]  ;;  %v124_v46 = vld [vmem:[%s4960_s1] sm:$0xff]  ;;  %vm1244_vm9 = vcmask 517120  }
   0xb   :  { %78 = vrot.lane.b32.xlu0 %v36_v4, %s3078_s9  ;;  %v3167_v15 = vsub.f32 %v131_v12, %v3161_v13  ;;  %336 = vmatpush.msra.mxu3 %v3161_v13  ;;  %v3201_v27 = vsub.f32 %v129_v20, %v3191_v23  ;;  %v3212_v32 = vsub.f32 %v128_v24, %v3203_v28  ;;  %v3240_v44 = vand.u32 4294901760, %v125_v40  ;;  %v40_v53 = vld [vmem:[%s4959_s0 + $0x40] sm:$0xff]  ;;  %v41_v0 = vld [vmem:[%s4959_s0 + $0x48] sm:$0xff]  ;;  %v3030_v4 = vld [vmem:[%s4960_s1 + $0x78] sm:$0xff]  ;;  %s3081_s21 = smov [#allocation4]   ;;  %s3014_s25 = sshll.u32 %s4966_s7, 4  ;;  %s3015_s25 = int_to_ptr.hbm [resolvable:$true] %s3014_s25 }
   0xc   :  { %153 = vmatpush.msra.mxu0 %v3161_v13  ;;  %v217_v22 = vand.u32 4294901760, %v3179_v19  ;;  %v234_v38 = vsub.f32 %v127_v29, %v3215_v33  ;;  %v240_v45 = vsub.f32 %v126_v35, %v3232_v39  ;;  %v3249_v50 = vand.u32 4294901760, %v124_v46  ;;  %51 = vst.msk [vmem:[#allocation2 + $0x28] sm:$0xff] %vm48_vm0, %v40_v53  ;;  %v3027_v14 = vld [vmem:[%s4960_s1 + $0x60] sm:$0xff]  ;;  %v3024_v34 = vld [vmem:[%s4960_s1 + $0x48] sm:$0xff]  ;;  %s3012_s22 = sshll.u32 %s3081_s21, 4  ;;  %s3013_s22 = int_to_ptr.vmem [resolvable:$true] %s3012_s22 }
   0xd   :  { %v211_v18 = vand.u32 4294901760, %v3167_v15  ;;  %284 = vmatpush.msra.mxu2 %v3167_v15  ;;  %338 = vmatpush.msra.mxu3 %v3169_v16  ;;  %v223_v31 = vand.u32 4294901760, %v3201_v27  ;;  %v229_v37 = vand.u32 4294901760, %v3212_v32  ;;  %v246_v49 = vsub.f32 %v125_v40, %v3240_v44  ;;  %30 = vst.msk [vmem:[#allocation2 + $0x18] sm:$0xff] %vm27_vm1, %v3079_v51  ;;  %v3023_v40 = vld [vmem:[%s4960_s1 + $0x40] sm:$0xff] }
   0xe   :  { %155 = vmatpush.msra.mxu0 %v3169_v16  ;;  %v218_v26 = vsub.f32 %v3179_v19, %v217_v22  ;;  %v235_v43 = vand.u32 4294901760, %v234_v38  ;;  %v241_v52 = vand.u32 4294901760, %v240_v45  ;;  %v252_v56 = vsub.f32 %v124_v46, %v3249_v50  ;;  %31 = vst.msk [vmem:[#allocation2 + $0x38] sm:$0xff] %vm27_vm1, %v3079_v51 }
   0xf   :  { %v212_v21 = vsub.f32 %v3167_v15, %v211_v18  ;;  %287 = vmatpush.msra.mxu2 %v3179_v19  ;;  %340 = vmatpush.msra.mxu3 %v3191_v23  ;;  %v224_v36 = vsub.f32 %v3201_v27, %v223_v31  ;;  %v230_v42 = vsub.f32 %v3212_v32, %v229_v37  ;;  %v247_v55 = vand.u32 4294901760, %v246_v49 }
  0x10   :  { %157 = vmatpush.msra.mxu0 %v3191_v23  ;;  %v219_v30 = vand.u32 4294901760, %v218_v26  ;;  %v236_v48 = vsub.f32 %v234_v38, %v235_v43  ;;  %v242_v57 = vsub.f32 %v240_v45, %v241_v52  ;;  %v253_v59 = vand.u32 4294901760, %v252_v56  ;;  %52 = vst.msk [vmem:[#allocation2 + $0x30] sm:$0xff] %vm48_vm0, %v41_v0 }
  0x11   :  { %v213_v25 = vand.u32 4294901760, %v212_v21  ;;  %290 = vmatpush.msra.mxu2 %v3201_v27  ;;  %342 = vmatpush.msra.mxu3 %v3203_v28  ;;  %v225_v41 = vand.u32 4294901760, %v224_v36  ;;  %v231_v47 = vand.u32 4294901760, %v230_v42  ;;  %v248_v58 = vsub.f32 %v246_v49, %v247_v55  ;;  %v3026_v21 = vld [vmem:[%s4960_s1 + $0x58] sm:$0xff]  ;;  %v3025_v27 = vld [vmem:[%s4960_s1 + $0x50] sm:$0xff] }
  0x12   :  { %82 = vrot.lane.b32.xlu1 %v44_v7, %s3078_s9  ;;  %103 = vrot.lane.b32.xlu2 %v46_v8, %s3076_s28  ;;  %v237_v54 = vand.u32 4294901760, %v236_v48  ;;  %v243_v60 = vand.u32 4294901760, %v242_v57  ;;  %v254_v62 = vsub.f32 %v252_v56, %v253_v59  ;;  %v3283_v5 = vand.u32 4294901760, %v3030_v4  ;;  %v3029_v7 = vld [vmem:[%s4960_s1 + $0x70] sm:$0xff] }
  0x13   :  { %61 = vrot.lane.b32.xlu0 %v42_v6, %s3077_s29  ;;  %214 = vmatpush.msra.mxu1 %v213_v25  ;;  %v249_v61 = vand.u32 4294901760, %v248_v58  ;;  %v3290_v8 = vand.u32 4294901760, %v3029_v7  ;;  %v3315_v19 = vand.u32 4294901760, %v3027_v14  ;;  %v3330_v25 = vand.u32 4294901760, %v3026_v21 }
  0x14   :  { %159 = vmatpush.msra.mxu0 %v3203_v28  ;;  %293 = vmatpush.msra.mxu2 %v3212_v32  ;;  %v255_v63 = vand.u32 4294901760, %v254_v62  ;;  %vm1262_vm10 = vcmask 1041920   ;;  %vm2816_vm11 = vcmask 261120   ;;  %vm3005_vm12 = vcmask 74752  }
  0x15   :  { %220 = vmatpush.msra.mxu1 %v219_v30  ;;  %344 = vmatpush.msra.mxu3 %v3215_v33  ;;  %v3334_v26 = vsub.f32 %v3027_v14, %v3315_v19  ;;  %v3344_v30 = vand.u32 4294901760, %v3025_v27 }
  0x16   :  { %161 = vmatpush.msra.mxu0 %v3215_v33  ;;  %296 = vmatpush.msra.mxu2 %v234_v38 }
  0x17   :  { %346 = vmatpush.msra.mxu3 %v3232_v39  ;;  %226 = vmatpush.msra.mxu1 %v225_v41  ;;  %v3359_v38 = vsub.f32 %v3025_v27, %v3344_v30 }
  0x18   :  { %163 = vmatpush.msra.mxu0 %v3232_v39  ;;  %299 = vmatpush.msra.mxu2 %v240_v45  ;;  %v3372_v45 = vand.u32 4294901760, %v3023_v40 }
  0x19   :  { %348 = vmatpush.msra.mxu3 %v3240_v44  ;;  %232 = vmatpush.msra.mxu1 %v231_v47 }
  0x1a   :  { %84 = vrot.lane.b32.xlu1 %v45_v10, %s3078_s9  ;;  %105 = vrot.lane.b32.xlu2 %v47_v11, %s3076_s28  ;;  %v3028_v10 = vld [vmem:[%s4960_s1 + $0x68] sm:$0xff] }
  0x1b   :  { %63 = vrot.lane.b32.xlu0 %v43_v9, %s3077_s29  ;;  %165 = vmatpush.msra.mxu0 %v3240_v44  ;;  %v3293_v9 = vsub.f32 %v3030_v4, %v3283_v5  ;;  %v3301_v12 = vand.u32 4294901760, %v3028_v10 }
  0x1c   :  { %302 = vmatpush.msra.mxu2 %v246_v49  ;;  %350 = vmatpush.msra.mxu3 %v3249_v50 }
  0x1d   :  { %238 = vmatpush.msra.mxu1 %v237_v54  ;;  %167 = vmatpush.msra.mxu0 %v3249_v50  ;;  %v570_v11 = vand.u32 4294901760, %v3293_v9  ;;  %v3318_v20 = vsub.f32 %v3028_v10, %v3301_v12 }
  0x1e   :  { %305 = vmatpush.msra.mxu2 %v252_v56 }
  0x1f   :  { %387 = vmatpush.msrb.mxu0 %v211_v18  ;;  %244 = vmatpush.msra.mxu1 %v243_v60  ;;  %v571_v17 = vsub.f32 %v3293_v9, %v570_v11  ;;  %v582_v24 = vand.u32 4294901760, %v3318_v20 }
  0x20   :  { %512 = vmatpush.msrb.mxu2 %v3283_v5 }
  0x21   :  { %391 = vmatpush.msrb.mxu0 %v217_v22  ;;  %250 = vmatpush.msra.mxu1 %v249_v61  ;;  %v572_v22 = vand.u32 4294901760, %v571_v17  ;;  %v583_v29 = vsub.f32 %v3318_v20, %v582_v24 }
  0x22   :  { %514 = vmatpush.msrb.mxu2 %v3290_v8 }
  0x23   :  { %395 = vmatpush.msrb.mxu0 %v223_v31  ;;  %256 = vmatpush.msra.mxu1 %v255_v63  ;;  %v3347_v31 = vsub.f32 %v3026_v21, %v3330_v25  ;;  %v584_v35 = vand.u32 4294901760, %v583_v29 }
  0x24   :  { %516 = vmatpush.msrb.mxu2 %v3301_v12  ;;  %573 = vmatpush.msrb.mxu3 %v572_v22 }
  0x25   :  { %399 = vmatpush.msrb.mxu0 %v229_v37  ;;  %442 = vmatpush.msrb.mxu1 %v3161_v13  ;;  %v3304_v13 = vsub.f32 %v3029_v7, %v3290_v8  ;;  %v594_v36 = vand.u32 4294901760, %v3347_v31  ;;  %v3356_v37 = vand.u32 4294901760, %v3024_v34 }
  0x26   :  { %518 = vmatpush.msrb.mxu2 %v3315_v19 }
  0x27   :  { %403 = vmatpush.msrb.mxu0 %v235_v43  ;;  %444 = vmatpush.msrb.mxu1 %v3169_v16  ;;  %v576_v18 = vand.u32 4294901760, %v3304_v13  ;;  %v595_v43 = vsub.f32 %v3347_v31, %v594_v36  ;;  %v3375_v46 = vsub.f32 %v3024_v34, %v3356_v37 }
  0x28   :  { %520 = vmatpush.msrb.mxu2 %v3330_v25 }
  0x29   :  { %407 = vmatpush.msrb.mxu0 %v241_v52  ;;  %446 = vmatpush.msrb.mxu1 %v3191_v23  ;;  %v577_v23 = vsub.f32 %v3304_v13, %v576_v18  ;;  %v596_v49 = vand.u32 4294901760, %v595_v43  ;;  %v606_v51 = vand.u32 4294901760, %v3375_v46  ;;  %v3385_v52 = vsub.f32 %v3023_v40, %v3372_v45 }
  0x2a   :  { %522 = vmatpush.msrb.mxu2 %v3344_v30 }
  0x2b   :  { %411 = vmatpush.msrb.mxu0 %v247_v55  ;;  %448 = vmatpush.msrb.mxu1 %v3203_v28  ;;  %v578_v28 = vand.u32 4294901760, %v577_v23  ;;  %v607_v57 = vsub.f32 %v3375_v46, %v606_v51 }
  0x2c   :  { %524 = vmatpush.msrb.mxu2 %v3356_v37 }
  0x2d   :  { %415 = vmatpush.msrb.mxu0 %v253_v59  ;;  %450 = vmatpush.msrb.mxu1 %v3215_v33  ;;  %v588_v33 = vand.u32 4294901760, %v3334_v26  ;;  %v612_v59 = vand.u32 4294901760, %v3385_v52  ;;  %v608_v62 = vand.u32 4294901760, %v607_v57 }
  0x2e   :  { %579 = vmatpush.msrb.mxu3 %v578_v28  ;;  %526 = vmatpush.msrb.mxu2 %v3372_v45 }
  0x2f   :  { %452 = vmatpush.msrb.mxu1 %v3232_v39  ;;  %v589_v39 = vsub.f32 %v3334_v26, %v588_v33  ;;  %v613_v0 = vsub.f32 %v3385_v52, %v612_v59 }
  0x30   :  { %585 = vmatpush.msrb.mxu3 %v584_v35 }
  0x31   :  { %454 = vmatpush.msrb.mxu1 %v3240_v44  ;;  %v600_v44 = vand.u32 4294901760, %v3359_v38  ;;  %v590_v47 = vand.u32 4294901760, %v589_v39 }
  0x33   :  { %456 = vmatpush.msrb.mxu1 %v3249_v50  ;;  %v601_v50 = vsub.f32 %v3359_v38, %v600_v44  ;;  %591 = vmatpush.msrb.mxu3 %v590_v47 }
  0x35   :  { %v602_v56 = vand.u32 4294901760, %v601_v50  ;;  %597 = vmatpush.msrb.mxu3 %v596_v49  ;;  %v3037_v49 = vld [vmem:[%s4960_s1 + $0xb0] sm:$0xff] }
  0x37   :  { %603 = vmatpush.msrb.mxu3 %v602_v56 }
  0x39   :  { %609 = vmatpush.msrb.mxu3 %v608_v62 }
  0x5c   :  { %v81_v1 = vpop.permute.xlu2 %80 }
  0x64   :  { %v102_v6 = vpop.permute.xlu2 %101 }
  0x6c   :  { %v104_v32 = vpop.permute.xlu2 %103 }
  0x74   :  { %v100_v2 = vpop.permute.xlu1 %99  ;;  %v106_v63 = vpop.permute.xlu2 %105 }
  0x75   :  { %v58_v3 = vpop.permute.xlu0 %57 }
  0x76   :  { %70 = vst.msk [vmem:[#allocation2 + $0x8] sm:$0xff] %vm69_vm2, %v58_v3 }
  0x7c   :  { %v60_v15 = vpop.permute.xlu1 %59 }
  0x7d   :  { %v79_v16 = vpop.permute.xlu0 %78  ;;  %71 = vst.msk [vmem:[#allocation2 + $0x10] sm:$0xff] %vm69_vm2, %v60_v15 }
  0x7e   :  { %91 = vst.msk [vmem:[#allocation2 + $0x8] sm:$0xff] %vm90_vm3, %v79_v16 }
  0x7f   :  { %112 = vst.msk [vmem:[#allocation2 + $0x8] sm:$0xff] %vm111_vm4, %v100_v2 }
  0x80   :  { %92 = vst.msk [vmem:[#allocation2 + $0x10] sm:$0xff] %vm90_vm3, %v81_v1 }
  0x81   :  { %113 = vst.msk [vmem:[#allocation2 + $0x10] sm:$0xff] %vm111_vm4, %v102_v6  ;;  %v614_v6 = vand.u32 4294901760, %v613_v0 }
  0x83   :  { %615 = vmatpush.msrb.mxu3 %v614_v6 }
  0x84   :  { %v83_v42 = vpop.permute.xlu1 %82 }
  0x85   :  { %v62_v41 = vpop.permute.xlu0 %61 }
  0x86   :  { %72 = vst.msk [vmem:[#allocation2 + $0x28] sm:$0xff] %vm69_vm2, %v62_v41  ;;  %v120_v48 = vld [vmem:[#allocation2 + $0x7] sm:$0xff] }
  0x87   :  { %93 = vst.msk [vmem:[#allocation2 + $0x28] sm:$0xff] %vm90_vm3, %v83_v42  ;;  %v133_v53 = vsel %vm27_vm1, %v120_v48, 0  ;;  %v478_v22 = vld [vmem:[#allocation2 + $0x8] sm:$0xff] }
  0x88   :  { %114 = vst.msk [vmem:[#allocation2 + $0x28] sm:$0xff] %vm111_vm4, %v104_v32  ;;  %v3389_v54 = vand.u32 4294901760, %v133_v53  ;;  %v121_v55 = vld [vmem:[#allocation2 + $0xf] sm:$0xff] }
  0x89   :  { %v136_v58 = vsel %vm27_vm1, %v121_v55, 0  ;;  %v479_v28 = vld [vmem:[#allocation2 + $0x10] sm:$0xff] }
  0x8a   :  { %258 = vmatmul.f32.vlgmr.msra.gmra.mxu1 %v3389_v54  ;;  %v169_v60 = vsub.f32 %v133_v53, %v3389_v54  ;;  %v3398_v61 = vand.u32 4294901760, %v136_v58 }
  0x8b   :  { %695 = vmatpush.msra.mxu1 %v3283_v5 }
  0x8c   :  { %308 = vmatmul.f32.vlgmr.msra.gmra.mxu2 %v169_v60  ;;  %v85_v2 = vpop.permute.xlu1 %84  ;;  %v170_v3 = vand.u32 4294901760, %v169_v60  ;;  %v177_v4 = vsub.f32 %v136_v58, %v3398_v61  ;;  %v3035_v58 = vld [vmem:[%s4960_s1 + $0xa0] sm:$0xff] }
  0x8d   :  { %v64_v1 = vpop.permute.xlu0 %63  ;;  %697 = vmatpush.msra.mxu1 %v3290_v8  ;;  %746 = vmatpush.msra.mxu2 %v570_v11 }
  0x8e   :  { %73 = vst.msk [vmem:[#allocation2 + $0x30] sm:$0xff] %vm69_vm2, %v64_v1  ;;  %354 = vmatmul.f32.vlgmr.msra.gmra.mxu3 %v170_v3  ;;  %v171_v7 = vsub.f32 %v169_v60, %v170_v3  ;;  %v178_v16 = vand.u32 4294901760, %v177_v4 }
  0x8f   :  { %94 = vst.msk [vmem:[#allocation2 + $0x30] sm:$0xff] %vm90_vm3, %v85_v2  ;;  %v122_v10 = vld [vmem:[#allocation2 + $0x27] sm:$0xff]  ;;  %699 = vmatpush.msra.mxu1 %v3301_v12  ;;  %750 = vmatpush.msra.mxu2 %v576_v18  ;;  %v3034_v2 = vld [vmem:[%s4960_s1 + $0x98] sm:$0xff] }
  0x90   :  { %115 = vst.msk [vmem:[#allocation2 + $0x30] sm:$0xff] %vm111_vm4, %v106_v63  ;;  %v139_v14 = vsel %vm27_vm1, %v122_v10, 0  ;;  %v172_v15 = vand.u32 4294901760, %v171_v7  ;;  %801 = vmatpush.msra.mxu3 %v3283_v5  ;;  %v179_v11 = vsub.f32 %v177_v4, %v178_v16  ;;  %v3537_v63 = vand.u32 4294901760, %v3035_v58 }
  0x91   :  { %v3413_v17 = vand.u32 4294901760, %v139_v14  ;;  %701 = vmatpush.msra.mxu1 %v3315_v19  ;;  %754 = vmatpush.msra.mxu2 %v582_v24  ;;  %v3555_v10 = vand.u32 4294901760, %v3034_v2 }
  0x92   :  { %173 = vmatmul.f32.vlgmr.msra.gmra.mxu0 %v172_v15  ;;  %262 = vmatmul.f32.gmra.mxu1 %v3398_v61  ;;  %v180_v23 = vand.u32 4294901760, %v179_v11  ;;  %v3552_v7 = vsub.f32 %v3035_v58, %v3537_v63 }
  0x93   :  { %803 = vmatpush.msra.mxu3 %v3290_v8  ;;  %v185_v21 = vsub.f32 %v139_v14, %v3413_v17  ;;  %643 = vmatpush.msra.mxu0 %v3293_v9  ;;  %v492_v8 = vsel %vm27_vm1, %v478_v22, 0  ;;  %v3571_v22 = vsub.f32 %v3034_v2, %v3555_v10 }
  0x94   :  { %313 = vmatmul.f32.gmra.mxu2 %v177_v4  ;;  %703 = vmatpush.msra.mxu1 %v3330_v25 }
  0x95   :  { %758 = vmatpush.msra.mxu2 %v588_v33  ;;  %646 = vmatpush.msra.mxu0 %v3304_v13  ;;  %v186_v24 = vand.u32 4294901760, %v185_v21  ;;  %v3441_v13 = vand.u32 4294901760, %v492_v8 }
  0x96   :  { %360 = vmatmul.f32.gmra.mxu3 %v178_v16  ;;  %705 = vmatpush.msra.mxu1 %v3344_v30  ;;  %v947_v16 = vand.u32 4294901760, %v3552_v7 }
  0x97   :  { %v123_v5 = vld [vmem:[#allocation2 + $0x2f] sm:$0xff]  ;;  %805 = vmatpush.msra.mxu3 %v3301_v12  ;;  %762 = vmatpush.msra.mxu2 %v594_v36  ;;  %v187_v12 = vsub.f32 %v185_v21, %v186_v24 }
  0x98   :  { %v142_v18 = vsel %vm27_vm1, %v123_v5, 0  ;;  %649 = vmatpush.msra.mxu0 %v3318_v20  ;;  %707 = vmatpush.msra.mxu1 %v3356_v37  ;;  %v495_v20 = vsel %vm27_vm1, %v479_v28, 0  ;;  %v481_v40 = vld [vmem:[#allocation2 + $0x30] sm:$0xff]  ;;  %v3032_v5 = vld [vmem:[%s4960_s1 + $0x88] sm:$0xff] }
  0x99   :  { %v3433_v9 = vand.u32 4294901760, %v142_v18  ;;  %807 = vmatpush.msra.mxu3 %v3315_v19  ;;  %766 = vmatpush.msra.mxu2 %v600_v44  ;;  %v3452_v19 = vsub.f32 %v492_v8, %v3441_v13  ;;  %v3463_v32 = vand.u32 4294901760, %v495_v20  ;;  %v501_v43 = vsel %vm27_vm1, %v481_v40, 0 }
  0x9a   :  { %181 = vmatmul.f32.gmra.mxu0 %v180_v23  ;;  %266 = vmatmul.f32.gmra.mxu1 %v3413_v17  ;;  %v948_v8 = vsub.f32 %v3552_v7, %v947_v16 }
  0x9b   :  { %809 = vmatpush.msra.mxu3 %v3330_v25  ;;  %v193_v27 = vsub.f32 %v142_v18, %v3433_v9  ;;  %652 = vmatpush.msra.mxu0 %v3334_v26  ;;  %v188_v25 = vand.u32 4294901760, %v187_v12  ;;  %v529_v29 = vand.u32 4294901760, %v3452_v19  ;;  %v3472_v34 = vsub.f32 %v495_v20, %v3463_v32 }
  0x9c   :  { %318 = vmatmul.f32.gmra.mxu2 %v185_v21  ;;  %709 = vmatpush.msra.mxu1 %v3372_v45  ;;  %v953_v12 = vand.u32 4294901760, %v3571_v22  ;;  %v949_v28 = vand.u32 4294901760, %v948_v8 }
  0x9d   :  { %770 = vmatpush.msra.mxu2 %v606_v51  ;;  %655 = vmatpush.msra.mxu0 %v3347_v31  ;;  %v194_v26 = vand.u32 4294901760, %v193_v27  ;;  %v480_v31 = vld [vmem:[#allocation2 + $0x28] sm:$0xff]  ;;  %v530_v33 = vsub.f32 %v3452_v19, %v529_v29  ;;  %v537_v39 = vand.u32 4294901760, %v3472_v34  ;;  %v3503_v51 = vand.u32 4294901760, %v3037_v49 }
  0x9e   :  { %366 = vmatmul.f32.gmra.mxu3 %v186_v24  ;;  %v498_v35 = vsel %vm27_vm1, %v480_v31, 0  ;;  %v882_v24 = vand.u32 4294901760, %v3032_v5  ;;  %v954_v31 = vsub.f32 %v3571_v22, %v953_v12 }
  0x9f   :  { %811 = vmatpush.msra.mxu3 %v3344_v30  ;;  %774 = vmatpush.msra.mxu2 %v612_v59  ;;  %v195_v30 = vsub.f32 %v193_v27, %v194_v26  ;;  %v538_v42 = vsub.f32 %v3472_v34, %v537_v39  ;;  %v3519_v56 = vsub.f32 %v3037_v49, %v3503_v51 }
  0xa0   :  { %658 = vmatpush.msra.mxu0 %v3359_v38  ;;  %v531_v38 = vand.u32 4294901760, %v530_v33 }
  0xa1   :  { %813 = vmatpush.msra.mxu3 %v3356_v37  ;;  %v196_v36 = vand.u32 4294901760, %v195_v30  ;;  %v3475_v37 = vand.u32 4294901760, %v498_v35  ;;  %v539_v47 = vand.u32 4294901760, %v538_v42  ;;  %v935_v60 = vand.u32 4294901760, %v3519_v56 }
  0xa2   :  { %189 = vmatmul.f32.gmra.mxu0 %v188_v25  ;;  %270 = vmatmul.f32.gmra.mxu1 %v3433_v9  ;;  %v964_v25 = vsub.f32 %v3032_v5, %v882_v24 }
  0xa3   :  { %815 = vmatpush.msra.mxu3 %v3372_v45  ;;  %661 = vmatpush.msra.mxu0 %v3375_v46  ;;  %v3480_v41 = vsub.f32 %v498_v35, %v3475_v37  ;;  %v3488_v45 = vand.u32 4294901760, %v501_v43  ;;  %v3038_v46 = vld [vmem:[%s4960_s1 + $0xb8] sm:$0xff]  ;;  %v936_v4 = vsub.f32 %v3519_v56, %v935_v60 }
  0xa4   :  { %323 = vmatmul.f32.gmra.mxu2 %v193_v27  ;;  %v3495_v48 = vand.u32 4294901760, %v3038_v46  ;;  %v3031_v27 = vld [vmem:[%s4960_s1 + $0x80] sm:$0xff]  ;;  %v965_v35 = vand.u32 4294901760, %v964_v25 }
  0xa5   :  { %664 = vmatpush.msra.mxu0 %v3385_v52  ;;  %v545_v44 = vand.u32 4294901760, %v3480_v41  ;;  %v3510_v53 = vsub.f32 %v501_v43, %v3488_v45  ;;  %v937_v14 = vand.u32 4294901760, %v936_v4 }
  0xa6   :  { %372 = vmatmul.f32.gmra.mxu3 %v194_v26  ;;  %v3501_v50 = vsub.f32 %v3038_v46, %v3495_v48  ;;  %v884_v26 = vand.u32 4294901760, %v3031_v27  ;;  %v966_v42 = vsub.f32 %v964_v25, %v965_v35 }
  0xa7   :  { %v546_v52 = vsub.f32 %v3480_v41, %v545_v44  ;;  %v553_v1 = vand.u32 4294901760, %v3510_v53 }
  0xa8   :  { %v929_v55 = vand.u32 4294901760, %v3501_v50 }
  0xa9   :  { %v547_v0 = vand.u32 4294901760, %v546_v52  ;;  %v554_v21 = vsub.f32 %v3510_v53, %v553_v1 }
  0xaa   :  { %197 = vmatmul.f32.gmra.mxu0 %v196_v36  ;;  %458 = vmatmul.f32.vlgmr.msrb.gmra.mxu1 %v3389_v54  ;;  %v930_v59 = vsub.f32 %v3501_v50, %v929_v55  ;;  %v970_v36 = vsub.f32 %v3031_v27, %v884_v26 }
  0xab   :  { %v555_v30 = vand.u32 4294901760, %v554_v21 }
  0xac   :  { %532 = vmatmul.f32.vlgmr.msrb.gmra.mxu2 %v531_v38  ;;  %v931_v3 = vand.u32 4294901760, %v930_v59  ;;  %v955_v38 = vand.u32 4294901760, %v954_v31  ;;  %v971_v43 = vand.u32 4294901760, %v970_v36 }
  0xad   :  { %1002 = vmatpush.msrb.mxu2 %v3501_v50 }
  0xae   :  { %617 = vmatmul.f32.vlgmr.msrb.gmra.mxu3 %v3441_v13  ;;  %932 = vmatpush.msrb.mxu1 %v931_v3  ;;  %v972_v46 = vsub.f32 %v970_v36, %v971_v43 }
  0xaf   :  { %1054 = vmatpush.msrb.mxu3 %v3495_v48  ;;  %1005 = vmatpush.msrb.mxu2 %v3519_v56 }
  0xb0   :  { %938 = vmatpush.msrb.mxu1 %v937_v14 }
  0xb1   :  { %1056 = vmatpush.msrb.mxu3 %v3503_v51 }
  0xb2   :  { %417 = vmatmul.f32.vlgmr.msrb.gmra.mxu0 %v3389_v54  ;;  %462 = vmatmul.f32.gmra.mxu1 %v3398_v61  ;;  %v3036_v54 = vld [vmem:[%s4960_s1 + $0xa8] sm:$0xff] }
  0xb3   :  { %871 = vmatpush.msrb.mxu0 %v3495_v48  ;;  %v3522_v57 = vand.u32 4294901760, %v3036_v54 }
  0xb4   :  { %540 = vmatmul.f32.gmra.mxu2 %v539_v47  ;;  %v973_v47 = vand.u32 4294901760, %v972_v46 }
  0xb5   :  { %873 = vmatpush.msrb.mxu0 %v3503_v51  ;;  %v3534_v62 = vsub.f32 %v3036_v54, %v3522_v57  ;;  %1058 = vmatpush.msrb.mxu3 %v3522_v57  ;;  %v840_v54 = vld [vmem:[#allocation2 + $0x31] sm:$0xff] }
  0xb6   :  { %621 = vmatmul.f32.gmra.mxu3 %v3463_v32  ;;  %v860_v56 = vsel %vm27_vm1, %v840_v54, 0 }
  0xb7   :  { %875 = vmatpush.msrb.mxu0 %v3522_v57  ;;  %v941_v6 = vand.u32 4294901760, %v3534_v62  ;;  %1008 = vmatpush.msrb.mxu2 %v3534_v62  ;;  %v910_v58 = vand.u32 4294901760, %v860_v56 }
  0xb8   :  { %1060 = vmatpush.msrb.mxu3 %v3537_v63 }
  0xb9   :  { %v942_v15 = vsub.f32 %v3534_v62, %v941_v6  ;;  %1011 = vmatpush.msrb.mxu2 %v3552_v7  ;;  %877 = vmatpush.msrb.mxu0 %v3537_v63 }
  0xba   :  { %421 = vmatmul.f32.gmra.mxu0 %v3398_v61  ;;  %466 = vmatmul.f32.gmra.mxu1 %v3413_v17  ;;  %v3033_v61 = vld [vmem:[%s4960_s1 + $0x90] sm:$0xff] }
  0xbb   :  { %v3565_v11 = vand.u32 4294901760, %v3033_v61  ;;  %1062 = vmatpush.msrb.mxu3 %v3555_v10  ;;  %v943_v18 = vand.u32 4294901760, %v942_v15  ;;  %1014 = vmatpush.msrb.mxu2 %v3571_v22 }
  0xbc   :  { %548 = vmatmul.f32.gmra.mxu2 %v547_v0  ;;  %879 = vmatpush.msrb.mxu0 %v3555_v10 }
  0xbd   :  { %v3583_v23 = vsub.f32 %v3033_v61, %v3565_v11  ;;  %944 = vmatpush.msrb.mxu1 %v943_v18  ;;  %1064 = vmatpush.msrb.mxu3 %v3565_v11 }
  0xbe   :  { %625 = vmatmul.f32.gmra.mxu3 %v3475_v37  ;;  %881 = vmatpush.msrb.mxu0 %v3565_v11 }
  0xbf   :  { %v959_v20 = vand.u32 4294901760, %v3583_v23  ;;  %1017 = vmatpush.msrb.mxu2 %v3583_v23  ;;  %950 = vmatpush.msrb.mxu1 %v949_v28 }
  0xc0   :  { %1066 = vmatpush.msrb.mxu3 %v882_v24  ;;  %883 = vmatpush.msrb.mxu0 %v882_v24 }
  0xc1   :  { %v960_v33 = vsub.f32 %v3583_v23, %v959_v20  ;;  %1020 = vmatpush.msrb.mxu2 %v964_v25  ;;  %956 = vmatpush.msrb.mxu1 %v955_v38 }
  0xc2   :  { %425 = vmatmul.f32.gmra.mxu0 %v3413_v17  ;;  %470 = vmatmul.f32.gmra.mxu1 %v3433_v9  ;;  %v967_v17 = vand.u32 4294901760, %v966_v42 }
  0xc3   :  { %v961_v40 = vand.u32 4294901760, %v960_v33  ;;  %1023 = vmatpush.msrb.mxu2 %v970_v36  ;;  %1068 = vmatpush.msrb.mxu3 %v884_v26 }
  0xc4   :  { %556 = vmatmul.f32.gmra.mxu2 %v555_v30  ;;  %885 = vmatpush.msrb.mxu0 %v884_v26 }
  0xc5   :  { %962 = vmatpush.msrb.mxu1 %v961_v40 }
  0xc6   :  { %629 = vmatmul.f32.gmra.mxu3 %v3488_v45 }
  0xc7   :  { %968 = vmatpush.msrb.mxu1 %v967_v17 }
  0xc9   :  { %974 = vmatpush.msrb.mxu1 %v973_v47 }
  0xca   :  { %429 = vmatmul.f32.gmra.mxu0 %v3433_v9  ;;  %713 = vmatmul.f32.vlgmr.msra.gmra.mxu1 %v529_v29  ;;  %v837_v9 = vld [vmem:[#allocation2 + $0x9] sm:$0xff]  ;;  %v838_v29 = vld [vmem:[#allocation2 + $0x11] sm:$0xff] }
  0xcb   :  { %1160 = vmatpush.msra.mxu1 %v3495_v48 }
  0xcc   :  { %776 = vmatmul.f32.vlgmr.msra.gmra.mxu2 %v3441_v13 }
  0xcd   :  { %1162 = vmatpush.msra.mxu1 %v3503_v51 }
  0xce   :  { %817 = vmatmul.f32.vlgmr.msra.gmra.mxu3 %v3441_v13  ;;  %v851_v13 = vsel %vm27_vm1, %v837_v9, 0 }
  0xcf   :  { %1164 = vmatpush.msra.mxu1 %v3522_v57 }
  0xd1   :  { %1166 = vmatpush.msra.mxu1 %v3537_v63 }
  0xd2   :  { %667 = vmatmul.f32.vlgmr.msra.gmra.mxu0 %v3452_v19  ;;  %719 = vmatmul.f32.gmra.mxu1 %v537_v39  ;;  %v886_v19 = vand.u32 4294901760, %v851_v13 }
  0xd3   :  { %1105 = vmatpush.msra.mxu0 %v929_v55  ;;  %1168 = vmatpush.msra.mxu1 %v3555_v10 }
  0xd4   :  { %780 = vmatmul.f32.gmra.mxu2 %v3463_v32 }
  0xd5   :  { %1109 = vmatpush.msra.mxu0 %v935_v60  ;;  %1170 = vmatpush.msra.mxu1 %v3565_v11  ;;  %v911_v60 = vsub.f32 %v860_v56, %v910_v58 }
  0xd6   :  { %821 = vmatmul.f32.gmra.mxu3 %v3463_v32  ;;  %v887_v32 = vsub.f32 %v851_v13, %v886_v19 }
  0xd7   :  { %1113 = vmatpush.msra.mxu0 %v941_v6  ;;  %1172 = vmatpush.msra.mxu1 %v882_v24  ;;  %v912_v63 = vand.u32 4294901760, %v911_v60 }
  0xd8   :  { %v888_v39 = vand.u32 4294901760, %v887_v32 }
  0xd9   :  { %1117 = vmatpush.msra.mxu0 %v947_v16  ;;  %1174 = vmatpush.msra.mxu1 %v884_v26  ;;  %v913_v0 = vsub.f32 %v911_v60, %v912_v63 }
  0xda   :  { %672 = vmatmul.f32.gmra.mxu0 %v3472_v34  ;;  %725 = vmatmul.f32.gmra.mxu1 %v545_v44  ;;  %v854_v34 = vsel %vm27_vm1, %v838_v29, 0  ;;  %v889_v48 = vsub.f32 %v887_v32, %v888_v39 }
  0xdb   :  { %1121 = vmatpush.msra.mxu0 %v953_v12  ;;  %v894_v44 = vand.u32 4294901760, %v854_v34  ;;  %v914_v2 = vand.u32 4294901760, %v913_v0 }
  0xdc   :  { %784 = vmatmul.f32.gmra.mxu2 %v3475_v37  ;;  %v890_v50 = vand.u32 4294901760, %v889_v48 }
  0xdd   :  { %1125 = vmatpush.msra.mxu0 %v959_v20 }
  0xde   :  { %825 = vmatmul.f32.gmra.mxu3 %v3475_v37  ;;  %v839_v37 = vld [vmem:[#allocation2 + $0x29] sm:$0xff] }
  0xdf   :  { %1129 = vmatpush.msra.mxu0 %v965_v35  ;;  %v857_v49 = vsel %vm27_vm1, %v839_v37, 0 }
  0xe0   :  { %v902_v52 = vand.u32 4294901760, %v857_v49 }
  0xe1   :  { %1133 = vmatpush.msra.mxu0 %v971_v43 }
  0xe2   :  { %677 = vmatmul.f32.gmra.mxu0 %v3480_v41  ;;  %731 = vmatmul.f32.gmra.mxu1 %v553_v1  ;;  %v895_v41 = vsub.f32 %v854_v34, %v894_v44  ;;  %v903_v55 = vsub.f32 %v857_v49, %v902_v52 }
  0xe4   :  { %788 = vmatmul.f32.gmra.mxu2 %v3488_v45  ;;  %v896_v51 = vand.u32 4294901760, %v895_v41  ;;  %v904_v57 = vand.u32 4294901760, %v903_v55 }
  0xe6   :  { %829 = vmatmul.f32.gmra.mxu3 %v3488_v45  ;;  %v897_v45 = vsub.f32 %v895_v41, %v896_v51  ;;  %v905_v59 = vsub.f32 %v903_v55, %v904_v57 }
  0xe8   :  { %v906_v62 = vand.u32 4294901760, %v905_v59 }
  0xea   :  { %682 = vmatmul.f32.gmra.mxu0 %v3510_v53  ;;  %976 = vmatmul.f32.vlgmr.msrb.gmra.mxu1 %v886_v19  ;;  %v898_v53 = vand.u32 4294901760, %v897_v45 }
  0xec   :  { %1026 = vmatmul.f32.vlgmr.msrb.gmra.mxu2 %v887_v32 }
  0xee   :  { %1072 = vmatmul.f32.vlgmr.msrb.gmra.mxu3 %v888_v39 }
  0xf2   :  { %891 = vmatmul.f32.vlgmr.msrb.gmra.mxu0 %v890_v50  ;;  %980 = vmatmul.f32.gmra.mxu1 %v894_v44 }
  0xf4   :  { %1031 = vmatmul.f32.gmra.mxu2 %v895_v41 }
  0xf6   :  { %1078 = vmatmul.f32.gmra.mxu3 %v896_v51 }
  0xfa   :  { %899 = vmatmul.f32.gmra.mxu0 %v898_v53  ;;  %984 = vmatmul.f32.gmra.mxu1 %v902_v52 }
  0xfc   :  { %1036 = vmatmul.f32.gmra.mxu2 %v903_v55 }
  0xfe   :  { %1084 = vmatmul.f32.gmra.mxu3 %v904_v57 }
 0x102   :  { %907 = vmatmul.f32.gmra.mxu0 %v906_v62  ;;  %988 = vmatmul.f32.gmra.mxu1 %v910_v58 }
 0x104   :  { %1041 = vmatmul.f32.gmra.mxu2 %v911_v60 }
 0x106   :  { %1090 = vmatmul.f32.gmra.mxu3 %v912_v63 }
 0x107   :  { %v259_v1 = vpop.f32.mrf.mxu1 }
 0x10a   :  { %915 = vmatmul.f32.gmra.mxu0 %v914_v2  ;;  %1176 = vmatmul.f32.vlgmr.msra.gmra.mxu1 %v886_v19 }
 0x10f   :  { %v174_v3 = vpop.f32.mrf.mxu0  ;;  %v263_v4 = vpop.f32.mrf.mxu1 }
 0x110   :  { %v309_v6 = vpop.f32.mrf.mxu2  ;;  %v260_v27 = vadd.f32 %v259_v1, %v174_v3  ;;  %v3649_v1 = vld [vmem:[%s4961_s2] ss:$0 sm:$0xff]  ;;  %s3080_s2 = smov 64  }
 0x111   :  { %v355_v7 = vpop.f32.mrf.mxu3 }
 0x112   :  { %1135 = vmatmul.f32.vlgmr.msra.gmra.mxu0 %v886_v19  ;;  %1180 = vmatmul.f32.gmra.mxu1 %v894_v44  ;;  %v310_v30 = vadd.f32 %v309_v6, %v260_v27 }
 0x114   :  { %v356_v36 = vadd.f32 %v355_v7, %v310_v30 }
 0x117   :  { %v182_v10 = vpop.f32.mrf.mxu0  ;;  %v267_v61 = vpop.f32.mrf.mxu1 }
 0x118   :  { %v264_v14 = vadd.f32 %v263_v4, %v182_v10  ;;  %v314_v15 = vpop.f32.mrf.mxu2 }
 0x119   :  { %v361_v16 = vpop.f32.mrf.mxu3 }
 0x11a   :  { %v315_v11 = vadd.f32 %v314_v15, %v264_v14  ;;  %1139 = vmatmul.f32.gmra.mxu0 %v894_v44  ;;  %1184 = vmatmul.f32.gmra.mxu1 %v902_v52 }
 0x11c   :  { %v362_v21 = vadd.f32 %v361_v16, %v315_v11 }
 0x11f   :  { %v190_v22 = vpop.f32.mrf.mxu0  ;;  %v271_v5 = vpop.f32.mrf.mxu1 }
 0x120   :  { %v268_v18 = vadd.f32 %v267_v61, %v190_v22  ;;  %v319_v8 = vpop.f32.mrf.mxu2 }
 0x121   :  { %v367_v23 = vpop.f32.mrf.mxu3 }
 0x122   :  { %v320_v24 = vadd.f32 %v319_v8, %v268_v18  ;;  %1143 = vmatmul.f32.gmra.mxu0 %v902_v52  ;;  %1188 = vmatmul.f32.gmra.mxu1 %v910_v58 }
 0x124   :  { %v368_v12 = vadd.f32 %v367_v23, %v320_v24 }
 0x127   :  { %v198_v28 = vpop.f32.mrf.mxu0  ;;  %v459_v20 = vpop.f32.mrf.mxu1 }
 0x128   :  { %v272_v25 = vadd.f32 %v271_v5, %v198_v28  ;;  %v324_v26 = vpop.f32.mrf.mxu2 }
 0x129   :  { %v373_v31 = vpop.f32.mrf.mxu3 }
 0x12a   :  { %v325_v33 = vadd.f32 %v324_v26, %v272_v25  ;;  %1147 = vmatmul.f32.gmra.mxu0 %v910_v58 }
 0x12c   :  { %v374_v35 = vadd.f32 %v373_v31, %v325_v33 }
 0x12f   :  { %v418_v38 = vpop.f32.mrf.mxu0  ;;  %v463_v40 = vpop.f32.mrf.mxu1 }
 0x130   :  { %v419_v42 = vadd.f32 %v418_v38, %v356_v36  ;;  %v533_v43 = vpop.f32.mrf.mxu2 }
 0x131   :  { %v618_v17 = vpop.f32.mrf.mxu3 }
 0x132   :  { %v3640_v46 = vadd.f32 %v459_v20, %v419_v42 }
 0x137   :  { %v422_v47 = vpop.f32.mrf.mxu0  ;;  %v467_v9 = vpop.f32.mrf.mxu1 }
 0x138   :  { %v423_v13 = vadd.f32 %v422_v47, %v362_v21  ;;  %v541_v19 = vpop.f32.mrf.mxu2 }
 0x139   :  { %v622_v29 = vpop.f32.mrf.mxu3 }
 0x13a   :  { %v464_v32 = vadd.f32 %v463_v40, %v423_v13  ;;  %v623_v34 = vadd.f32 %v622_v29, %v541_v19  ;;  %v474_v13 = vadd.f32 %v3649_v1, %v3640_v46 }
 0x13c   :  { %v475_v4 = vadd.f32 %v3649_v1, %v464_v32 }
 0x13f   :  { %v426_v39 = vpop.f32.mrf.mxu0  ;;  %v471_v44 = vpop.f32.mrf.mxu1 }
 0x140   :  { %v427_v37 = vadd.f32 %v426_v39, %v368_v12  ;;  %v549_v48 = vpop.f32.mrf.mxu2  ;;  %v619_v12 = vadd.f32 %v618_v17, %v533_v43 }
 0x141   :  { %v626_v41 = vpop.f32.mrf.mxu3 }
 0x142   :  { %v3642_v49 = vadd.f32 %v467_v9, %v427_v37  ;;  %v627_v47 = vadd.f32 %v626_v41, %v549_v48 }
 0x147   :  { %v430_v50 = vpop.f32.mrf.mxu0  ;;  %v714_v51 = vpop.f32.mrf.mxu1 }
 0x148   :  { %v431_v52 = vadd.f32 %v430_v50, %v374_v35  ;;  %v557_v54 = vpop.f32.mrf.mxu2 }
 0x149   :  { %v630_v45 = vpop.f32.mrf.mxu3 }
 0x14a   :  { %v3644_v55 = vadd.f32 %v471_v44, %v431_v52 }
 0x14f   :  { %v668_v56 = vpop.f32.mrf.mxu0  ;;  %v720_v53 = vpop.f32.mrf.mxu1 }
 0x150   :  { %v777_v57 = vpop.f32.mrf.mxu2  ;;  %v669_v28 = vadd.f32 %v668_v56, %v619_v12  ;;  %v631_v56 = vadd.f32 %v630_v45, %v557_v54 }
 0x151   :  { %v818_v58 = vpop.f32.mrf.mxu3 }
 0x152   :  { %v715_v25 = vadd.f32 %v714_v51, %v669_v28 }
 0x154   :  { %v778_v33 = vadd.f32 %v777_v57, %v715_v25 }
 0x156   :  { %v819_v40 = vadd.f32 %v818_v58, %v778_v33 }
 0x157   :  { %v673_v59 = vpop.f32.mrf.mxu0  ;;  %v726_v60 = vpop.f32.mrf.mxu1 }
 0x158   :  { %v674_v62 = vadd.f32 %v673_v59, %v623_v34  ;;  %v781_v0 = vpop.f32.mrf.mxu2  ;;  %v833_v29 = vadd.f32 %v819_v40, %v474_v13 }
 0x159   :  { %v822_v3 = vpop.f32.mrf.mxu3 }
 0x15a   :  { %v721_v63 = vadd.f32 %v720_v53, %v674_v62 }
 0x15c   :  { %v782_v2 = vadd.f32 %v781_v0, %v721_v63 }
 0x15e   :  { %v823_v6 = vadd.f32 %v822_v3, %v782_v2 }
 0x15f   :  { %v678_v7 = vpop.f32.mrf.mxu0  ;;  %v732_v10 = vpop.f32.mrf.mxu1 }
 0x160   :  { %v3652_v61 = vadd.f32 %v823_v6, %v475_v4  ;;  %v785_v16 = vpop.f32.mrf.mxu2  ;;  %v679_v43 = vadd.f32 %v678_v7, %v627_v47 }
 0x161   :  { %v826_v22 = vpop.f32.mrf.mxu3 }
 0x162   :  { %v727_v39 = vadd.f32 %v726_v60, %v679_v43  ;;  %v476_v60 = vadd.f32 %v3649_v1, %v3642_v49  ;;  %v477_v49 = vadd.f32 %v3649_v1, %v3644_v55 }
 0x164   :  { %v786_v48 = vadd.f32 %v785_v16, %v727_v39 }
 0x166   :  { %v827_v59 = vadd.f32 %v826_v22, %v786_v48 }
 0x167   :  { %v683_v14 = vpop.f32.mrf.mxu0  ;;  %v977_v15 = vpop.f32.mrf.mxu1 }
 0x168   :  { %v789_v8 = vpop.f32.mrf.mxu2  ;;  %v684_v41 = vadd.f32 %v683_v14, %v631_v56  ;;  %v835_v45 = vadd.f32 %v827_v59, %v476_v60 }
 0x169   :  { %v830_v23 = vpop.f32.mrf.mxu3 }
 0x16a   :  { %v733_v62 = vadd.f32 %v732_v10, %v684_v41 }
 0x16c   :  { %v790_v7 = vadd.f32 %v789_v8, %v733_v62 }
 0x16f   :  { %v892_v11 = vpop.f32.mrf.mxu0  ;;  %v981_v21 = vpop.f32.mrf.mxu1 }
 0x170   :  { %v1027_v20 = vpop.f32.mrf.mxu2  ;;  %v978_v26 = vadd.f32 %v977_v15, %v892_v11 }
 0x171   :  { %v1073_v31 = vpop.f32.mrf.mxu3 }
 0x172   :  { %v1028_v35 = vadd.f32 %v1027_v20, %v978_v26 }
 0x174   :  { %v1074_v42 = vadd.f32 %v1073_v31, %v1028_v35 }
 0x177   :  { %v900_v5 = vpop.f32.mrf.mxu0  ;;  %v985_v18 = vpop.f32.mrf.mxu1 }
 0x178   :  { %v1032_v38 = vpop.f32.mrf.mxu2  ;;  %v982_v53 = vadd.f32 %v981_v21, %v900_v5  ;;  %v831_v5 = vadd.f32 %v830_v23, %v790_v7 }
 0x179   :  { %v1079_v17 = vpop.f32.mrf.mxu3 }
 0x17a   :  { %v1033_v58 = vadd.f32 %v1032_v38, %v982_v53  ;;  %v836_v28 = vadd.f32 %v831_v5, %v477_v49 }
 0x17c   :  { %v1080_v4 = vadd.f32 %v1079_v17, %v1033_v58 }
 0x17f   :  { %v908_v24 = vpop.f32.mrf.mxu0  ;;  %v989_v27 = vpop.f32.mrf.mxu1 }
 0x180   :  { %v986_v37 = vadd.f32 %v985_v18, %v908_v24  ;;  %v1037_v51 = vpop.f32.mrf.mxu2 }
 0x181   :  { %v1085_v57 = vpop.f32.mrf.mxu3 }
 0x182   :  { %v1038_v46 = vadd.f32 %v1037_v51, %v986_v37 }
 0x184   :  { %v1086_v63 = vadd.f32 %v1085_v57, %v1038_v46 }
 0x187   :  { %v916_v30 = vpop.f32.mrf.mxu0  ;;  %v1177_v36 = vpop.f32.mrf.mxu1 }
 0x188   :  { %v990_v0 = vadd.f32 %v989_v27, %v916_v30  ;;  %v1042_v6 = vpop.f32.mrf.mxu2 }
 0x189   :  { %v1091_v21 = vpop.f32.mrf.mxu3 }
 0x18a   :  { %v1043_v15 = vadd.f32 %v1042_v6, %v990_v0 }
 0x18c   :  { %v1092_v22 = vadd.f32 %v1091_v21, %v1043_v15 }
 0x18f   :  { %v1136_v9 = vpop.f32.mrf.mxu0  ;;  %v1181_v44 = vpop.f32.mrf.mxu1 }
 0x190   :  { %v1137_v19 = vadd.f32 %v1136_v9, %v1074_v42 }
 0x192   :  { %v1178_v32 = vadd.f32 %v1177_v36, %v1137_v19 }
 0x194   :  { %v1192_v34 = vadd.f32 %v1178_v32, %v833_v29 }
 0x196   :  { %v1196_v50 = vmax.f32 %v1192_v34, 0.0 }
 0x197   :  { %v1140_v52 = vpop.f32.mrf.mxu0  ;;  %v1185_v2 = vpop.f32.mrf.mxu1 }
 0x198   :  { %1204 = vrot.lane.b32.xlu1 %v1196_v50, %s3080_s2  ;;  %v1141_v16 = vadd.f32 %v1140_v52, %v1080_v4 }
 0x19a   :  { %v1182_v10 = vadd.f32 %v1181_v44, %v1141_v16 }
 0x19c   :  { %v1193_v8 = vadd.f32 %v1182_v10, %v3652_v61 }
 0x19e   :  { %v1197_v26 = vmax.f32 %v1193_v8, 0.0 }
 0x19f   :  { %v1144_v3 = vpop.f32.mrf.mxu0  ;;  %v1189_v27 = vpop.f32.mrf.mxu1 }
 0x1a0   :  { %v1145_v54 = vadd.f32 %v1144_v3, %v1086_v63 }
 0x1a2   :  { %v1186_v14 = vadd.f32 %v1185_v2, %v1145_v54 }
 0x1a4   :  { %v1194_v11 = vadd.f32 %v1186_v14, %v835_v45 }
 0x1a6   :  { %v1198_v18 = vmax.f32 %v1194_v11, 0.0 }
 0x1a7   :  { %v1148_v24 = vpop.f32.mrf.mxu0 }
 0x1a8   :  { %v1149_v12 = vadd.f32 %v1148_v24, %v1092_v22  ;;  %1208 = vrot.lane.b32.xlu0 %v1198_v18, %s3080_s2 }
 0x1aa   :  { %v1190_v20 = vadd.f32 %v1189_v27, %v1149_v12 }
 0x1ac   :  { %v1195_v25 = vadd.f32 %v1190_v20, %v836_v28 }
 0x1ae   :  { %v1199_v31 = vmax.f32 %v1195_v25, 0.0 }
 0x1b0   :  { %1206 = vrot.lane.b32.xlu0 %v1197_v26, %s3080_s2  ;;  %1210 = vrot.lane.b32.xlu2 %v1199_v31, %s3080_s2 }
 0x20a   :  { %v1205_v23 = vpop.permute.xlu1 %1204  ;;  %v1211_v1 = vpop.permute.xlu2 %1210 }
 0x20b   :  { %v1216_v30 = vmax.f32 %v1196_v50, %v1205_v23  ;;  %v1219_v38 = vmax.f32 %v1199_v31, %v1211_v1 }
 0x20d   :  { %v1222_v33 = vrot.slane %v1216_v30, 1  ;;  %v1299_v61 = vrot.slane %v1219_v38, 1 }
 0x20f   :  { %v1226_v35 = vmax.f32 %v1216_v30, %v1222_v33  ;;  %v1303_v43 = vmax.f32 %v1219_v38, %v1299_v61 }
 0x211   :  { %1246 = vst.sshfl [vmem:[#allocation1] sm:$0xff pattern:$0x73625140] %v1226_v35  ;;  %v1308_v37 = vrot.slane %v1303_v43, 7 }
 0x218   :  { %v1248_v55 = vld [vmem:[#allocation1 + $0x1] ss:$4 sm:$0xff] }
 0x219   :  { %1264 = vst.sshfl [vmem:[#allocation1] sm:$0xff pattern:$0x73625140] %v1226_v35 }
 0x21a   :  { %v1209_v36 = vpop.permute.xlu0 %1208 }
 0x21b   :  { %v1218_v40 = vmax.f32 %v1198_v18, %v1209_v36  ;;  %v1379_v36 = vld [vmem:[%s4962_s3 + $0x70] sm:$0xff] }
 0x21d   :  { %v1223_v42 = vrot.slane %v1218_v40, 1 }
 0x21f   :  { %v1227_v47 = vmax.f32 %v1218_v40, %v1223_v42  ;;  %v3716_v40 = vand.u32 4294901760, %v1379_v36  ;;  %v1378_v42 = vld [vmem:[%s4962_s3 + $0x68] sm:$0xff] }
 0x220   :  { %v1266_v9 = vld [vmem:[#allocation1 + $0x2] ss:$4 sm:$0xff] }
 0x221   :  { %1279 = vst.sshfl [vmem:[#allocation1] sm:$0xff pattern:$0x73625140] %v1226_v35  ;;  %v1234_v13 = vrot.slane %v1227_v47, 7 }
 0x222   :  { %1249 = vst.sshfl [vmem:[#allocation1 + $0x20] sm:$0xff pattern:$0x73625140] %v1227_v47  ;;  %v1207_v19 = vpop.permute.xlu0 %1206 }
 0x223   :  { %v1217_v17 = vmax.f32 %v1197_v26, %v1207_v19  ;;  %v1236_v29 = vsel %vm1235_vm5, %v1234_v13, %v1226_v35 }
 0x224   :  { %v1238_v32 = vsel %vm1237_vm6, %v1234_v13, %v1236_v29 }
 0x225   :  { %v1298_v34 = vrot.slane %v1217_v17, 1  ;;  %v1240_v39 = vsel %vm1239_vm7, %v1234_v13, %v1238_v32  ;;  %v1376_v32 = vld [vmem:[%s4962_s3 + $0x58] sm:$0xff] }
 0x226   :  { %v1242_v44 = vsel %vm1241_vm8, %v1234_v13, %v1240_v39  ;;  %v1377_v13 = vld [vmem:[%s4962_s3 + $0x60] sm:$0xff] }
 0x227   :  { %v1302_v50 = vmax.f32 %v1217_v17, %v1298_v34  ;;  %1245 = vst.msk [vmem:[#allocation3] sm:$0x3] %vm1244_vm9, %v1242_v44  ;;  %v3743_v29 = vand.u32 4294901760, %v1377_v13 }
 0x228   :  { %v1281_v51 = vld [vmem:[#allocation1 + $0x3] ss:$4 sm:$0xff] }
 0x229   :  { %v1251_v52 = vld [vmem:[#allocation1 + $0x21] ss:$4 sm:$0xff]  ;;  %v1309_v56 = vsel %vm1235_vm5, %v1308_v37, %v1302_v50  ;;  %1315 = vst.sshfl [vmem:[#allocation1] sm:$0xff pattern:$0x73625140] %v1302_v50 }
 0x22a   :  { %1267 = vst.sshfl [vmem:[#allocation1 + $0x20] sm:$0xff pattern:$0x73625140] %v1227_v47  ;;  %v1254_v53 = vrot.slane %v1251_v52, 7  ;;  %v1310_v48 = vsel %vm1237_vm6, %v1308_v37, %v1309_v56 }
 0x22b   :  { %v1311_v41 = vsel %vm1239_vm7, %v1308_v37, %v1310_v48 }
 0x22c   :  { %v1255_v46 = vsel %vm1235_vm5, %v1254_v53, %v1248_v55  ;;  %v1312_v57 = vsel %vm1241_vm8, %v1308_v37, %v1311_v41  ;;  %v1380_v55 = vld [vmem:[%s4962_s3 + $0x78] sm:$0xff]  ;;  %v3755_v37 = vsub.f32 %v1377_v13, %v3743_v29 }
 0x22d   :  { %v1256_v58 = vsel %vm1237_vm6, %v1254_v53, %v1255_v46  ;;  %1314 = vst.msk [vmem:[#allocation3 + $0x4] sm:$0x3] %vm1244_vm9, %v1312_v57  ;;  %v3708_v1 = vand.u32 4294901760, %v1380_v55  ;;  %v1374_v46 = vld [vmem:[%s4962_s3 + $0x48] sm:$0xff] }
 0x22e   :  { %v1257_v59 = vsel %vm1239_vm7, %v1254_v53, %v1256_v58 }
 0x22f   :  { %v1258_v62 = vsel %vm1241_vm8, %v1254_v53, %v1257_v59  ;;  %v3714_v38 = vsub.f32 %v1380_v55, %v3708_v1  ;;  %1640 = vmatpush.msrb.mxu1 %v3708_v1  ;;  %1444 = vmatpush.msra.mxu2 %v3708_v1  ;;  %v1504_v53 = vand.u32 4294901760, %v3755_v37 }
 0x230   :  { %1259 = vrot.lane.b32.xlu1 %v1258_v62, %s3080_s2  ;;  %v1317_v63 = vld [vmem:[#allocation1 + $0x1] ss:$4 sm:$0xff]  ;;  %v3786_v62 = vand.u32 4294901760, %v1374_v46 }
 0x231   :  { %v1269_v0 = vld [vmem:[#allocation1 + $0x22] ss:$4 sm:$0xff]  ;;  %1332 = vst.sshfl [vmem:[#allocation1] sm:$0xff pattern:$0x73625140] %v1302_v50  ;;  %v1486_v61 = vand.u32 4294901760, %v3714_v38  ;;  %1587 = vmatpush.msrb.mxu0 %v3714_v38  ;;  %1642 = vmatpush.msrb.mxu1 %v3716_v40  ;;  %v1505_v58 = vsub.f32 %v3755_v37, %v1504_v53 }
 0x232   :  { %1282 = vst.sshfl [vmem:[#allocation1 + $0x20] sm:$0xff pattern:$0x73625140] %v1227_v47  ;;  %v1272_v60 = vrot.slane %v1269_v0, 7  ;;  %v3725_v47 = vsub.f32 %v1379_v36, %v3716_v40  ;;  %1446 = vmatpush.msra.mxu2 %v3716_v40  ;;  %v1372_v0 = vld [vmem:[%s4962_s3 + $0x38] sm:$0xff] }
 0x233   :  { %v1487_v19 = vsub.f32 %v3714_v38, %v1486_v61  ;;  %v1392_v38 = vld [vmem:[%s4962_s3 + $0xd8] sm:$0xff] }
 0x234   :  { %v1273_v2 = vsel %vm1235_vm5, %v1272_v60, %v1266_v9  ;;  %v3728_v9 = vand.u32 4294901760, %v1378_v42  ;;  %1590 = vmatpush.msrb.mxu0 %v3725_v47 }
 0x235   :  { %v1274_v3 = vsel %vm1237_vm6, %v1272_v60, %v1273_v2  ;;  %v1488_v34 = vand.u32 4294901760, %v1487_v19 }
 0x236   :  { %v1275_v4 = vsel %vm1239_vm7, %v1272_v60, %v1274_v3  ;;  %v3740_v17 = vsub.f32 %v1378_v42, %v3728_v9  ;;  %1644 = vmatpush.msrb.mxu1 %v3728_v9  ;;  %1448 = vmatpush.msra.mxu2 %v3728_v9 }
 0x237   :  { %v1276_v54 = vsel %vm1241_vm8, %v1272_v60, %v1275_v4  ;;  %1489 = vmatpush.msra.mxu3 %v1488_v34  ;;  %v1371_v60 = vld [vmem:[%s4962_s3 + $0x30] sm:$0xff]  ;;  %v3802_v4 = vand.u32 4294901760, %v1372_v0 }
 0x238   :  { %v1334_v45 = vld [vmem:[#allocation1 + $0x2] ss:$4 sm:$0xff]  ;;  %1278 = vst.msk [vmem:[#allocation3 + $0x2] sm:$0x3] %vm1244_vm9, %v1276_v54  ;;  %v1498_v44 = vand.u32 4294901760, %v3740_v17  ;;  %1593 = vmatpush.msrb.mxu0 %v3740_v17  ;;  %1646 = vmatpush.msrb.mxu1 %v3743_v29  ;;  %v3804_v54 = vand.u32 4294901760, %v1371_v60 }
 0x239   :  { %v1284_v6 = vld [vmem:[#allocation1 + $0x23] ss:$4 sm:$0xff]  ;;  %1347 = vst.sshfl [vmem:[#allocation1] sm:$0xff pattern:$0x73625140] %v1302_v50  ;;  %v3759_v50 = vand.u32 4294901760, %v1376_v32  ;;  %1450 = vmatpush.msra.mxu2 %v3743_v29 }
 0x23a   :  { %v1287_v7 = vrot.slane %v1284_v6, 7  ;;  %1318 = vst.sshfl [vmem:[#allocation1 + $0x20] sm:$0xff pattern:$0x73625140] %v1303_v43  ;;  %v1499_v56 = vsub.f32 %v3740_v17, %v1498_v44  ;;  %1596 = vmatpush.msrb.mxu0 %v3755_v37  ;;  %v1369_v6 = vld [vmem:[%s4962_s3 + $0x20] sm:$0xff] }
 0x23b   :  { %v3773_v41 = vsub.f32 %v1376_v32, %v3759_v50  ;;  %1648 = vmatpush.msrb.mxu1 %v3759_v50  ;;  %1452 = vmatpush.msra.mxu2 %v3759_v50 }
 0x23c   :  { %v1288_v15 = vsel %vm1235_vm5, %v1287_v7, %v1281_v51  ;;  %v1375_v51 = vld [vmem:[%s4962_s3 + $0x50] sm:$0xff]  ;;  %v1500_v57 = vand.u32 4294901760, %v1499_v56 }
 0x23d   :  { %v1289_v16 = vsel %vm1237_vm6, %v1287_v7, %v1288_v15  ;;  %v3770_v48 = vand.u32 4294901760, %v1375_v51  ;;  %v1510_v2 = vand.u32 4294901760, %v3773_v41  ;;  %1599 = vmatpush.msrb.mxu0 %v3773_v41 }
 0x23e   :  { %v1290_v14 = vsel %vm1239_vm7, %v1287_v7, %v1289_v16  ;;  %v3814_v16 = vsub.f32 %v1374_v46, %v3786_v62 }
 0x23f   :  { %v1291_v11 = vsel %vm1241_vm8, %v1287_v7, %v1290_v14  ;;  %v3784_v59 = vsub.f32 %v1375_v51, %v3770_v48  ;;  %1650 = vmatpush.msrb.mxu1 %v3770_v48  ;;  %v1506_v7 = vand.u32 4294901760, %v1505_v58  ;;  %1454 = vmatpush.msra.mxu2 %v3770_v48 }
 0x240   :  { %1292 = vrot.lane.b32.xlu2 %v1291_v11, %s3080_s2  ;;  %v1349_v31 = vld [vmem:[#allocation1 + $0x3] ss:$4 sm:$0xff]  ;;  %v1511_v11 = vsub.f32 %v3773_v41, %v1510_v2 }
 0x241   :  { %v1320_v21 = vld [vmem:[#allocation1 + $0x21] ss:$4 sm:$0xff]  ;;  %v1516_v15 = vand.u32 4294901760, %v3784_v59  ;;  %1602 = vmatpush.msrb.mxu0 %v3784_v59  ;;  %1652 = vmatpush.msrb.mxu1 %v3786_v62 }
 0x242   :  { %v1323_v5 = vrot.slane %v1320_v21, 7  ;;  %1335 = vst.sshfl [vmem:[#allocation1 + $0x20] sm:$0xff pattern:$0x73625140] %v1303_v43  ;;  %1456 = vmatpush.msra.mxu2 %v3786_v62 }
 0x243   :  { %1605 = vmatpush.msrb.mxu0 %v3814_v16 }
 0x244   :  { %v1324_v22 = vsel %vm1235_vm5, %v1323_v5, %v1317_v63  ;;  %v1373_v63 = vld [vmem:[%s4962_s3 + $0x40] sm:$0xff] }
 0x245   :  { %v1325_v10 = vsel %vm1237_vm6, %v1323_v5, %v1324_v22  ;;  %v3799_v3 = vand.u32 4294901760, %v1373_v63  ;;  %v3830_v22 = vand.u32 4294901760, %v1369_v6 }
 0x246   :  { %v1326_v18 = vsel %vm1239_vm7, %v1323_v5, %v1325_v10  ;;  %v1517_v10 = vsub.f32 %v3784_v59, %v1516_v15 }
 0x247   :  { %v1327_v24 = vsel %vm1241_vm8, %v1323_v5, %v1326_v18  ;;  %v3824_v21 = vsub.f32 %v1373_v63, %v3799_v3  ;;  %v3827_v5 = vsub.f32 %v1372_v0, %v3802_v4  ;;  %v1522_v18 = vand.u32 4294901760, %v3814_v16  ;;  %1654 = vmatpush.msrb.mxu1 %v3799_v3  ;;  %1458 = vmatpush.msra.mxu2 %v3799_v3 }
 0x248   :  { %1328 = vrot.lane.b32.xlu0 %v1327_v24, %s3080_s2  ;;  %v3837_v24 = vsub.f32 %v1371_v60, %v3804_v54  ;;  %v1366_v60 = vld [vmem:[%s4962_s3 + $0x8] sm:$0xff] }
 0x249   :  { %v1337_v49 = vld [vmem:[#allocation1 + $0x22] ss:$4 sm:$0xff]  ;;  %1608 = vmatpush.msrb.mxu0 %v3824_v21  ;;  %1656 = vmatpush.msrb.mxu1 %v3802_v4 }
 0x24a   :  { %1350 = vst.sshfl [vmem:[#allocation1 + $0x20] sm:$0xff pattern:$0x73625140] %v1303_v43  ;;  %v1340_v12 = vrot.slane %v1337_v49, 7  ;;  %v1492_v43 = vand.u32 4294901760, %v3725_v47  ;;  %1460 = vmatpush.msra.mxu2 %v3802_v4 }
 0x24b   :  { %1611 = vmatpush.msrb.mxu0 %v3827_v5  ;;  %1658 = vmatpush.msrb.mxu1 %v3804_v54 }
 0x24c   :  { %v1341_v27 = vsel %vm1235_vm5, %v1340_v12, %v1334_v45  ;;  %v1493_v39 = vsub.f32 %v3725_v47, %v1492_v43  ;;  %v1370_v45 = vld [vmem:[%s4962_s3 + $0x28] sm:$0xff]  ;;  %1462 = vmatpush.msra.mxu2 %v3804_v54  ;;  %v1391_v47 = vld [vmem:[%s4962_s3 + $0xd0] sm:$0xff] }
 0x24d   :  { %v1342_v28 = vsel %vm1237_vm6, %v1340_v12, %v1341_v27  ;;  %v3817_v14 = vand.u32 4294901760, %v1370_v45  ;;  %v1512_v27 = vand.u32 4294901760, %v1511_v11  ;;  %1614 = vmatpush.msrb.mxu0 %v3837_v24  ;;  %v1365_v11 = vld [vmem:[%s4962_s3] sm:$0xff]  ;;  %v4006_v17 = vand.u32 4294901760, %v1391_v47 }
 0x24e   :  { %v1343_v20 = vsel %vm1239_vm7, %v1340_v12, %v1342_v28  ;;  %v1494_v52 = vand.u32 4294901760, %v1493_v39  ;;  %v1528_v28 = vand.u32 4294901760, %v3824_v21 }
 0x24f   :  { %v1344_v8 = vsel %vm1241_vm8, %v1340_v12, %v1343_v20  ;;  %v3841_v49 = vsub.f32 %v1370_v45, %v3817_v14  ;;  %v1368_v12 = vld [vmem:[%s4962_s3 + $0x18] sm:$0xff]  ;;  %v1534_v20 = vand.u32 4294901760, %v3827_v5  ;;  %1660 = vmatpush.msrb.mxu1 %v3817_v14  ;;  %1464 = vmatpush.msra.mxu2 %v3817_v14  ;;  %v3909_v45 = vand.u32 4294901760, %v1366_v60 }
 0x250   :  { %1346 = vst.msk [vmem:[#allocation3 + $0x6] sm:$0x3] %vm1244_vm9, %v1344_v8  ;;  %1495 = vmatpush.msra.mxu3 %v1494_v52  ;;  %v3851_v8 = vsub.f32 %v1369_v6, %v3830_v22  ;;  %v3869_v55 = vand.u32 4294901760, %v1368_v12 }
 0x251   :  { %v1352_v25 = vld [vmem:[#allocation1 + $0x23] ss:$4 sm:$0xff]  ;;  %1617 = vmatpush.msrb.mxu0 %v3841_v49  ;;  %1662 = vmatpush.msrb.mxu1 %v3830_v22 }
 0x252   :  { %v1355_v26 = vrot.slane %v1352_v25, 7  ;;  %1501 = vmatpush.msra.mxu3 %v1500_v57  ;;  %v1367_v25 = vld [vmem:[%s4962_s3 + $0x10] sm:$0xff]  ;;  %v1552_v32 = vand.u32 4294901760, %v3851_v8  ;;  %v3881_v34 = vsub.f32 %v1368_v12, %v3869_v55  ;;  %1466 = vmatpush.msra.mxu2 %v3830_v22  ;;  %v3923_v12 = vand.u32 4294901760, %v1365_v11 }
 0x253   :  { %v3873_v42 = vand.u32 4294901760, %v1367_v25  ;;  %1620 = vmatpush.msrb.mxu0 %v3851_v8  ;;  %1664 = vmatpush.msrb.mxu1 %v3869_v55 }
 0x254   :  { %v1356_v23 = vsel %vm1235_vm5, %v1355_v26, %v1349_v31  ;;  %1507 = vmatpush.msra.mxu3 %v1506_v7  ;;  %v1523_v31 = vsub.f32 %v3814_v16, %v1522_v18  ;;  %v1558_v56 = vand.u32 4294901760, %v3881_v34  ;;  %v1553_v57 = vsub.f32 %v3851_v8, %v1552_v32  ;;  %1468 = vmatpush.msra.mxu2 %v3869_v55  ;;  %v1383_v8 = vld [vmem:[%s4962_s3 + $0x90] sm:$0xff] }
 0x255   :  { %v1357_v30 = vsel %vm1237_vm6, %v1355_v26, %v1356_v23  ;;  %v1540_v23 = vand.u32 4294901760, %v3837_v24  ;;  %v3886_v39 = vsub.f32 %v1367_v25, %v3873_v42  ;;  %1623 = vmatpush.msrb.mxu0 %v3881_v34  ;;  %1666 = vmatpush.msrb.mxu1 %v3873_v42 }
 0x256   :  { %v1358_v33 = vsel %vm1239_vm7, %v1355_v26, %v1357_v30  ;;  %1513 = vmatpush.msra.mxu3 %v1512_v27  ;;  %v1529_v30 = vsub.f32 %v3824_v21, %v1528_v28  ;;  %v1524_v36 = vand.u32 4294901760, %v1523_v31  ;;  %v1559_v0 = vsub.f32 %v3881_v34, %v1558_v56  ;;  %1470 = vmatpush.msra.mxu2 %v3873_v42  ;;  %v1387_v21 = vld [vmem:[%s4962_s3 + $0xb0] sm:$0xff] }
 0x257   :  { %v1359_v35 = vsel %vm1241_vm8, %v1355_v26, %v1358_v33  ;;  %v1518_v26 = vand.u32 4294901760, %v1517_v10  ;;  %v1535_v33 = vsub.f32 %v3827_v5, %v1534_v20  ;;  %v1541_v19 = vsub.f32 %v3837_v24, %v1540_v23  ;;  %1626 = vmatpush.msrb.mxu0 %v3886_v39  ;;  %1668 = vmatpush.msrb.mxu1 %v3909_v45  ;;  %v1386_v5 = vld [vmem:[%s4962_s3 + $0xa8] sm:$0xff]  ;;  %v1385_v24 = vld [vmem:[%s4962_s3 + $0xa0] sm:$0xff] }
 0x258   :  { %1360 = vrot.lane.b32.xlu1 %v1359_v35, %s3080_s2  ;;  %v1546_v35 = vand.u32 4294901760, %v3841_v49  ;;  %v1530_v13 = vand.u32 4294901760, %v1529_v30  ;;  %v1564_v58 = vand.u32 4294901760, %v3886_v39  ;;  %v1554_v6 = vand.u32 4294901760, %v1553_v57  ;;  %1472 = vmatpush.msra.mxu2 %v3909_v45  ;;  %v1394_v57 = vld [vmem:[%s4962_s3 + $0xe8] sm:$0xff] }
 0x259   :  { %1519 = vmatpush.msra.mxu3 %v1518_v26  ;;  %v1536_v51 = vand.u32 4294901760, %v1535_v33  ;;  %v1542_v46 = vand.u32 4294901760, %v1541_v19  ;;  %v3921_v10 = vsub.f32 %v1366_v60, %v3909_v45  ;;  %v1560_v27 = vand.u32 4294901760, %v1559_v0  ;;  %1670 = vmatpush.msrb.mxu1 %v3923_v12 }
 0x25a   :  { %v1547_v52 = vsub.f32 %v3841_v49, %v1546_v35  ;;  %v1565_v7 = vsub.f32 %v3886_v39, %v1564_v58  ;;  %v3930_v26 = vsub.f32 %v1365_v11, %v3923_v12  ;;  %1474 = vmatpush.msra.mxu2 %v3923_v12  ;;  %v3977_v11 = vand.u32 4294901760, %v1392_v38  ;;  %v1384_v49 = vld [vmem:[%s4962_s3 + $0x98] sm:$0xff] }
 0x25b   :  { %1525 = vmatpush.msra.mxu3 %v1524_v36  ;;  %v1570_v25 = vand.u32 4294901760, %v3921_v10  ;;  %1629 = vmatpush.msrb.mxu0 %v3921_v10  ;;  %v1396_v36 = vld [vmem:[%s4962_s3 + $0xf8] sm:$0xff] }
 0x25c   :  { %v1548_v63 = vand.u32 4294901760, %v1547_v52  ;;  %v1566_v31 = vand.u32 4294901760, %v1565_v7  ;;  %v1576_v33 = vand.u32 4294901760, %v3930_v26  ;;  %v3945_v19 = vand.u32 4294901760, %v1396_v36  ;;  %1681 = vmatpush.msrb.mxu2 %v1486_v61 }
 0x25d   :  { %1531 = vmatpush.msra.mxu3 %v1530_v13  ;;  %v1571_v30 = vsub.f32 %v3921_v10, %v1570_v25  ;;  %1632 = vmatpush.msrb.mxu0 %v3930_v26 }
 0x25e   :  { %v1577_v52 = vsub.f32 %v3930_v26, %v1576_v33  ;;  %v3964_v0 = vsub.f32 %v1396_v36, %v3945_v19  ;;  %1685 = vmatpush.msrb.mxu2 %v1492_v43  ;;  %v3996_v43 = vsub.f32 %v1392_v38, %v3977_v11 }
 0x25f   :  { %1537 = vmatpush.msra.mxu3 %v1536_v51  ;;  %v1572_v51 = vand.u32 4294901760, %v1571_v30  ;;  %1785 = vmatpush.msra.mxu0 %v3945_v19 }
 0x260   :  { %v1578_v61 = vand.u32 4294901760, %v1577_v52  ;;  %1689 = vmatpush.msrb.mxu2 %v1498_v44  ;;  %v1851_v44 = vand.u32 4294901760, %v3996_v43 }
 0x261   :  { %1543 = vmatpush.msra.mxu3 %v1542_v46  ;;  %v1395_v46 = vld [vmem:[%s4962_s3 + $0xf0] sm:$0xff] }
 0x262   :  { %v3966_v60 = vand.u32 4294901760, %v1395_v46  ;;  %1693 = vmatpush.msrb.mxu2 %v1504_v53 }
 0x263   :  { %1549 = vmatpush.msra.mxu3 %v1548_v63  ;;  %v1393_v63 = vld [vmem:[%s4962_s3 + $0xe0] sm:$0xff] }
 0x264   :  { %v3970_v7 = vand.u32 4294901760, %v1393_v63  ;;  %1787 = vmatpush.msra.mxu0 %v3966_v60  ;;  %1697 = vmatpush.msrb.mxu2 %v1510_v2  ;;  %v4039_v2 = vsub.f32 %v1391_v47, %v4006_v17 }
 0x265   :  { %1555 = vmatpush.msra.mxu3 %v1554_v6  ;;  %v3968_v6 = vand.u32 4294901760, %v1394_v57 }
 0x266   :  { %v3988_v36 = vsub.f32 %v1393_v63, %v3970_v7  ;;  %1701 = vmatpush.msrb.mxu2 %v1516_v15  ;;  %v1857_v15 = vand.u32 4294901760, %v4039_v2 }
 0x267   :  { %1561 = vmatpush.msra.mxu3 %v1560_v27  ;;  %v1827_v27 = vand.u32 4294901760, %v3964_v0  ;;  %v3985_v30 = vsub.f32 %v1394_v57, %v3968_v6  ;;  %1789 = vmatpush.msra.mxu0 %v3968_v6 }
 0x268   :  { %1705 = vmatpush.msrb.mxu2 %v1522_v18  ;;  %v1858_v16 = vsub.f32 %v4039_v2, %v1857_v15 }
 0x269   :  { %1567 = vmatpush.msra.mxu3 %v1566_v31  ;;  %v3982_v31 = vsub.f32 %v1395_v46, %v3966_v60  ;;  %v1839_v52 = vand.u32 4294901760, %v3985_v30  ;;  %v1845_v46 = vand.u32 4294901760, %v3988_v36  ;;  %1791 = vmatpush.msra.mxu0 %v3970_v7 }
 0x26a   :  { %1709 = vmatpush.msrb.mxu2 %v1528_v28  ;;  %v1859_v28 = vand.u32 4294901760, %v1858_v16 }
 0x26b   :  { %1573 = vmatpush.msra.mxu3 %v1572_v51  ;;  %v1833_v51 = vand.u32 4294901760, %v3982_v31  ;;  %1793 = vmatpush.msra.mxu0 %v3977_v11 }
 0x26c   :  { %1713 = vmatpush.msrb.mxu2 %v1534_v20 }
 0x26d   :  { %1579 = vmatpush.msra.mxu3 %v1578_v61  ;;  %v1834_v38 = vsub.f32 %v3982_v31, %v1833_v51  ;;  %v1840_v61 = vsub.f32 %v3985_v30, %v1839_v52  ;;  %1795 = vmatpush.msra.mxu0 %v4006_v17 }
 0x26e   :  { %1717 = vmatpush.msrb.mxu2 %v1540_v23 }
 0x26f   :  { %1748 = vmatpush.msrb.mxu3 %v3708_v1  ;;  %v1846_v1 = vsub.f32 %v3988_v36, %v1845_v46  ;;  %v1835_v37 = vand.u32 4294901760, %v1834_v38  ;;  %v1841_v53 = vand.u32 4294901760, %v1840_v61 }
 0x270   :  { %1721 = vmatpush.msrb.mxu2 %v1546_v35 }
 0x271   :  { %1750 = vmatpush.msrb.mxu3 %v3716_v40  ;;  %v1847_v40 = vand.u32 4294901760, %v1846_v1 }
 0x272   :  { %1725 = vmatpush.msrb.mxu2 %v1552_v32  ;;  %v1382_v32 = vld [vmem:[%s4962_s3 + $0x88] sm:$0xff] }
 0x273   :  { %1752 = vmatpush.msrb.mxu3 %v3728_v9  ;;  %v1389_v9 = vld [vmem:[%s4962_s3 + $0xc0] sm:$0xff] }
 0x274   :  { %1729 = vmatpush.msrb.mxu2 %v1558_v56 }
 0x275   :  { %1754 = vmatpush.msrb.mxu3 %v3743_v29  ;;  %v1388_v29 = vld [vmem:[%s4962_s3 + $0xb8] sm:$0xff] }
 0x276   :  { %v4065_v38 = vand.u32 4294901760, %v1388_v29  ;;  %1733 = vmatpush.msrb.mxu2 %v1564_v58 }
 0x277   :  { %1756 = vmatpush.msrb.mxu3 %v3759_v50 }
 0x278   :  { %1737 = vmatpush.msrb.mxu2 %v1570_v25 }
 0x279   :  { %1758 = vmatpush.msrb.mxu3 %v3770_v48  ;;  %v4085_v48 = vsub.f32 %v1388_v29, %v4065_v38  ;;  %v4129_v29 = vand.u32 4294901760, %v1384_v49 }
 0x27a   :  { %1741 = vmatpush.msrb.mxu2 %v1576_v33 }
 0x27b   :  { %1760 = vmatpush.msrb.mxu3 %v3786_v62 }
 0x27d   :  { %1762 = vmatpush.msrb.mxu3 %v3799_v3 }
 0x27f   :  { %1764 = vmatpush.msrb.mxu3 %v3802_v4 }
 0x281   :  { %1766 = vmatpush.msrb.mxu3 %v3804_v54 }
 0x283   :  { %1768 = vmatpush.msrb.mxu3 %v3817_v14 }
 0x285   :  { %1770 = vmatpush.msrb.mxu3 %v3830_v22 }
 0x287   :  { %1772 = vmatpush.msrb.mxu3 %v3869_v55 }
 0x289   :  { %1774 = vmatpush.msrb.mxu3 %v3873_v42 }
 0x28b   :  { %1776 = vmatpush.msrb.mxu3 %v3909_v45 }
 0x28d   :  { %1778 = vmatpush.msrb.mxu3 %v3923_v12 }
 0x29a   :  { %v1293_v13 = vpop.permute.xlu2 %1292 }
 0x29b   :  { %1295 = vst.msk [vmem:[#allocation3 + $0x2] sm:$0x3] %vm1262_vm10, %v1293_v13  ;;  %v1828_v13 = vsub.f32 %v3964_v0, %v1827_v27 }
 0x29d   :  { %v1829_v63 = vand.u32 4294901760, %v1828_v13  ;;  %v1852_v13 = vsub.f32 %v3996_v43, %v1851_v44 }
 0x29f   :  { %1830 = vmatpush.msra.mxu1 %v1829_v63  ;;  %v1853_v59 = vand.u32 4294901760, %v1852_v13  ;;  %v4049_v63 = vand.u32 4294901760, %v1389_v9  ;;  %v4096_v13 = vand.u32 4294901760, %v1386_v5 }
 0x2a1   :  { %1836 = vmatpush.msra.mxu1 %v1835_v37  ;;  %v4068_v50 = vsub.f32 %v1389_v9, %v4049_v63  ;;  %v4081_v37 = vand.u32 4294901760, %v1387_v21  ;;  %v4110_v9 = vand.u32 4294901760, %v1385_v24 }
 0x2a2   :  { %v1260_v57 = vpop.permute.xlu1 %1259 }
 0x2a3   :  { %1263 = vst.msk [vmem:[#allocation3] sm:$0x3] %vm1262_vm10, %v1260_v57  ;;  %v1390_v57 = vld [vmem:[%s4962_s3 + $0xc8] sm:$0xff]  ;;  %1842 = vmatpush.msra.mxu1 %v1841_v53  ;;  %v1869_v1 = vand.u32 4294901760, %v4068_v50  ;;  %v4099_v62 = vsub.f32 %v1387_v21, %v4081_v37  ;;  %v4132_v16 = vsub.f32 %v1385_v24, %v4110_v9 }
 0x2a4   :  { %v4036_v41 = vand.u32 4294901760, %v1390_v57 }
 0x2a5   :  { %1848 = vmatpush.msra.mxu1 %v1847_v40  ;;  %v1870_v53 = vsub.f32 %v4068_v50, %v1869_v1  ;;  %v1881_v40 = vand.u32 4294901760, %v4099_v62  ;;  %v1893_v54 = vand.u32 4294901760, %v4132_v16 }
 0x2a6   :  { %1797 = vmatpush.msra.mxu0 %v4036_v41  ;;  %v4052_v47 = vsub.f32 %v1390_v57, %v4036_v41  ;;  %v1875_v57 = vand.u32 4294901760, %v4085_v48 }
 0x2a7   :  { %1854 = vmatpush.msra.mxu1 %v1853_v59  ;;  %v1871_v23 = vand.u32 4294901760, %v1870_v53  ;;  %v4113_v59 = vsub.f32 %v1386_v5, %v4096_v13  ;;  %v1882_v35 = vsub.f32 %v4099_v62, %v1881_v40  ;;  %v4148_v5 = vand.u32 4294901760, %v1383_v8 }
 0x2a8   :  { %1799 = vmatpush.msra.mxu0 %v4049_v63  ;;  %v1863_v18 = vand.u32 4294901760, %v4052_v47  ;;  %v1876_v3 = vsub.f32 %v4085_v48, %v1875_v57  ;;  %v4154_v53 = vand.u32 4294901760, %v1382_v32  ;;  %v1894_v56 = vsub.f32 %v4132_v16, %v1893_v54 }
 0x2a9   :  { %1860 = vmatpush.msra.mxu1 %v1859_v28  ;;  %v1887_v4 = vand.u32 4294901760, %v4113_v59  ;;  %v1883_v28 = vand.u32 4294901760, %v1882_v35  ;;  %v4161_v24 = vsub.f32 %v1383_v8, %v4148_v5 }
 0x2aa   :  { %v1864_v61 = vsub.f32 %v4052_v47, %v1863_v18  ;;  %1801 = vmatpush.msra.mxu0 %v4065_v38  ;;  %v1877_v21 = vand.u32 4294901760, %v1876_v3  ;;  %v1895_v3 = vand.u32 4294901760, %v1894_v56 }
 0x2ac   :  { %v1865_v20 = vand.u32 4294901760, %v1864_v61  ;;  %1803 = vmatpush.msra.mxu0 %v4081_v37  ;;  %v1888_v61 = vsub.f32 %v4113_v59, %v1887_v4 }
 0x2ae   :  { %1866 = vmatpush.msra.mxu1 %v1865_v20  ;;  %1805 = vmatpush.msra.mxu0 %v4096_v13  ;;  %v4152_v20 = vsub.f32 %v1384_v49, %v4129_v29  ;;  %v1889_v34 = vand.u32 4294901760, %v1888_v61  ;;  %v1905_v49 = vand.u32 4294901760, %v4161_v24 }
 0x2b0   :  { %1872 = vmatpush.msra.mxu1 %v1871_v23  ;;  %1807 = vmatpush.msra.mxu0 %v4110_v9  ;;  %v1899_v14 = vand.u32 4294901760, %v4152_v20  ;;  %v1381_v23 = vld [vmem:[%s4962_s3 + $0x80] sm:$0xff]  ;;  %v1906_v58 = vsub.f32 %v4161_v24, %v1905_v49 }
 0x2b1   :  { %v4172_v35 = vand.u32 4294901760, %v1381_v23 }
 0x2b2   :  { %1809 = vmatpush.msra.mxu0 %v4129_v29  ;;  %1878 = vmatpush.msra.mxu1 %v1877_v21  ;;  %v4175_v21 = vsub.f32 %v1382_v32, %v4154_v53  ;;  %v1900_v22 = vsub.f32 %v4152_v20, %v1899_v14  ;;  %v1907_v10 = vand.u32 4294901760, %v1906_v58 }
 0x2b3   :  { %v4189_v32 = vsub.f32 %v1381_v23, %v4172_v35 }
 0x2b4   :  { %1811 = vmatpush.msra.mxu0 %v4148_v5  ;;  %1884 = vmatpush.msra.mxu1 %v1883_v28  ;;  %v1911_v8 = vand.u32 4294901760, %v4175_v21  ;;  %v1901_v55 = vand.u32 4294901760, %v1900_v22 }
 0x2b5   :  { %v1917_v28 = vand.u32 4294901760, %v4189_v32 }
 0x2b6   :  { %1813 = vmatpush.msra.mxu0 %v4154_v53  ;;  %1890 = vmatpush.msra.mxu1 %v1889_v34  ;;  %v1912_v25 = vsub.f32 %v4175_v21, %v1911_v8 }
 0x2b7   :  { %v1918_v26 = vsub.f32 %v4189_v32, %v1917_v28 }
 0x2b8   :  { %1815 = vmatpush.msra.mxu0 %v4172_v35  ;;  %1896 = vmatpush.msra.mxu1 %v1895_v3  ;;  %v1913_v61 = vand.u32 4294901760, %v1912_v25 }
 0x2b9   :  { %v1919_v42 = vand.u32 4294901760, %v1918_v26 }
 0x2ba   :  { %v1329_v39 = vpop.permute.xlu0 %1328  ;;  %1902 = vmatpush.msra.mxu1 %v1901_v55 }
 0x2bb   :  { %1331 = vst.msk [vmem:[#allocation3 + $0x4] sm:$0x3] %vm1262_vm10, %v1329_v39 }
 0x2bc   :  { %1908 = vmatpush.msra.mxu1 %v1907_v10 }
 0x2be   :  { %1914 = vmatpush.msra.mxu1 %v1913_v61 }
 0x2c0   :  { %1920 = vmatpush.msra.mxu1 %v1919_v42 }
 0x2ca   :  { %v1361_v33 = vpop.permute.xlu1 %1360 }
 0x2cb   :  { %1363 = vst.msk [vmem:[#allocation3 + $0x6] sm:$0x3] %vm1262_vm10, %v1361_v33 }
 0x2d2   :  { %v1364_v34 = vld [vmem:[#allocation3] sm:$0xff] }
 0x2d3   :  { %1434 = vst [vmem:[#allocation1] ss:$4 sm:$0xff] %v1364_v34  ;;  %v1401_v34 = vld [vmem:[%s4962_s3 + $0x120] sm:$0xff] }
 0x2da   :  { %v1435_v56 = vld.sshfl [vmem:[#allocation1] sm:$0xff pattern:$0x73625140]  ;;  %v1436_v23 = vld.sshfl [vmem:[#allocation1 + $0x8] sm:$0xff pattern:$0x73625140] }
 0x2db   :  { %v1475_v45 = vand.u32 4294901760, %v1435_v56  ;;  %v4205_v3 = vand.u32 4294901760, %v1436_v23 }
 0x2dd   :  { %1581 = vmatmul.f32.vlgmr.msra.gmra.mxu3 %v1475_v45  ;;  %v1476_v22 = vsub.f32 %v1435_v56, %v1475_v45  ;;  %v4208_v39 = vsub.f32 %v1436_v23, %v4205_v3 }
 0x2de   :  { %1981 = vmatpush.msra.mxu3 %v3945_v19 }
 0x2df   :  { %1635 = vmatmul.f32.vlgmr.msrb.gmra.mxu0 %v1476_v22  ;;  %v1477_v12 = vand.u32 4294901760, %v1476_v22  ;;  %v1818_v58 = vand.u32 4294901760, %v4208_v39 }
 0x2e0   :  { %1983 = vmatpush.msra.mxu3 %v3966_v60  ;;  %2022 = vmatpush.msrb.mxu0 %v1827_v27 }
 0x2e1   :  { %1674 = vmatmul.f32.vlgmr.msrb.gmra.mxu1 %v1477_v12  ;;  %v1478_v55 = vsub.f32 %v1476_v22, %v1477_v12  ;;  %v1819_v10 = vsub.f32 %v4208_v39, %v1818_v58  ;;  %v4414_v12 = vand.u32 4294901760, %v1401_v34 }
 0x2e2   :  { %1985 = vmatpush.msra.mxu3 %v3968_v6  ;;  %2026 = vmatpush.msrb.mxu0 %v1833_v51 }
 0x2e3   :  { %2089 = vmatpush.msrb.mxu1 %v3945_v19  ;;  %v1479_v25 = vand.u32 4294901760, %v1478_v55  ;;  %v1820_v27 = vand.u32 4294901760, %v1819_v10  ;;  %v1412_v19 = vld [vmem:[%s4962_s3 + $0x178] sm:$0xff] }
 0x2e4   :  { %1987 = vmatpush.msra.mxu3 %v3970_v7  ;;  %2030 = vmatpush.msrb.mxu0 %v1839_v52 }
 0x2e5   :  { %2091 = vmatpush.msrb.mxu1 %v3966_v60  ;;  %1480 = vmatmul.f32.vlgmr.msra.gmra.mxu2 %v1479_v25  ;;  %v4249_v60 = vand.u32 4294901760, %v1412_v19 }
 0x2e6   :  { %1780 = vmatmul.f32.vlgmr.msrb.gmra.mxu3 %v1475_v45  ;;  %1928 = vmatpush.msra.mxu2 %v3964_v0  ;;  %v1411_v0 = vld [vmem:[%s4962_s3 + $0x170] sm:$0xff] }
 0x2e7   :  { %1989 = vmatpush.msra.mxu3 %v3977_v11  ;;  %2034 = vmatpush.msrb.mxu0 %v1845_v46 }
 0x2e8   :  { %2093 = vmatpush.msrb.mxu1 %v3968_v6  ;;  %1821 = vmatmul.f32.vlgmr.msra.gmra.mxu0 %v1820_v27  ;;  %v1410_v6 = vld [vmem:[%s4962_s3 + $0x168] sm:$0xff] }
 0x2e9   :  { %1931 = vmatpush.msra.mxu2 %v3982_v31  ;;  %1991 = vmatpush.msra.mxu3 %v4006_v17  ;;  %v4269_v31 = vsub.f32 %v1412_v19, %v4249_v60  ;;  %v1398_v27 = vld [vmem:[%s4962_s3 + $0x108] sm:$0xff] }
 0x2ea   :  { %2038 = vmatpush.msrb.mxu0 %v1851_v44  ;;  %2095 = vmatpush.msrb.mxu1 %v3970_v7  ;;  %v4258_v7 = vand.u32 4294901760, %v1411_v0  ;;  %v1407_v44 = vld [vmem:[%s4962_s3 + $0x150] sm:$0xff] }
 0x2eb   :  { %1922 = vmatmul.f32.vlgmr.msra.gmra.mxu1 %v4205_v3  ;;  %1934 = vmatpush.msra.mxu2 %v3985_v30  ;;  %v4271_v30 = vand.u32 4294901760, %v1410_v6  ;;  %v4985_v52 = vand.u32 4294901760, %v4269_v31 }
 0x2ec   :  { %1993 = vmatpush.msra.mxu3 %v4036_v41  ;;  %2042 = vmatpush.msrb.mxu0 %v1857_v15 }
 0x2ed   :  { %2097 = vmatpush.msrb.mxu1 %v3977_v11  ;;  %1937 = vmatpush.msra.mxu2 %v3988_v36  ;;  %v1409_v11 = vld [vmem:[%s4962_s3 + $0x160] sm:$0xff]  ;;  %v1408_v36 = vld [vmem:[%s4962_s3 + $0x158] sm:$0xff]  ;;  %v4293_v46 = vsub.f32 %v1410_v6, %v4271_v30  ;;  %v4442_v6 = vsub.f32 %v1401_v34, %v4414_v12 }
 0x2ee   :  { %1995 = vmatpush.msra.mxu3 %v4049_v63  ;;  %2046 = vmatpush.msrb.mxu0 %v1863_v18  ;;  %v4284_v51 = vand.u32 4294901760, %v1409_v11  ;;  %v2169_v18 = vsub.f32 %v4269_v31, %v4985_v52 }
 0x2ef   :  { %2099 = vmatpush.msrb.mxu1 %v4006_v17  ;;  %1743 = vmatmul.f32.vlgmr.msrb.gmra.mxu2 %v1475_v45  ;;  %v4295_v17 = vand.u32 4294901760, %v1408_v36  ;;  %v1400_v45 = vld [vmem:[%s4962_s3 + $0x118] sm:$0xff] }
 0x2f0   :  { %1940 = vmatpush.msra.mxu2 %v3996_v43  ;;  %1997 = vmatpush.msra.mxu3 %v4065_v38  ;;  %v4282_v43 = vsub.f32 %v1411_v0, %v4258_v7  ;;  %v4310_v15 = vsub.f32 %v1409_v11, %v4284_v51 }
 0x2f1   :  { %2050 = vmatpush.msrb.mxu0 %v1869_v1  ;;  %2101 = vmatpush.msrb.mxu1 %v4036_v41  ;;  %v1406_v41 = vld [vmem:[%s4962_s3 + $0x148] sm:$0xff] }
 0x2f2   :  { %1943 = vmatpush.msra.mxu2 %v4039_v2  ;;  %1999 = vmatpush.msra.mxu3 %v4081_v37  ;;  %v4983_v2 = vand.u32 4294901760, %v4282_v43  ;;  %v4329_v1 = vand.u32 4294901760, %v1406_v41 }
 0x2f3   :  { %2054 = vmatpush.msrb.mxu0 %v1875_v57  ;;  %2103 = vmatpush.msrb.mxu1 %v4049_v63  ;;  %v4314_v63 = vand.u32 4294901760, %v1407_v44  ;;  %v1404_v57 = vld [vmem:[%s4962_s3 + $0x138] sm:$0xff] }
 0x2f4   :  { %1946 = vmatpush.msra.mxu2 %v4052_v47  ;;  %2001 = vmatpush.msra.mxu3 %v4096_v13  ;;  %v1405_v47 = vld [vmem:[%s4962_s3 + $0x140] sm:$0xff] }
 0x2f5   :  { %2058 = vmatpush.msrb.mxu0 %v1881_v40  ;;  %2105 = vmatpush.msrb.mxu1 %v4065_v38  ;;  %v4982_v38 = vand.u32 4294901760, %v4293_v46  ;;  %v2170_v40 = vand.u32 4294901760, %v2169_v18 }
 0x2f6   :  { %1949 = vmatpush.msra.mxu2 %v4068_v50  ;;  %2003 = vmatpush.msra.mxu3 %v4110_v9  ;;  %v4327_v50 = vsub.f32 %v1408_v36, %v4295_v17  ;;  %v1397_v36 = vld [vmem:[%s4962_s3 + $0x100] sm:$0xff] }
 0x2f7   :  { %2062 = vmatpush.msrb.mxu0 %v1887_v4  ;;  %2107 = vmatpush.msrb.mxu1 %v4081_v37  ;;  %v2175_v37 = vsub.f32 %v4282_v43, %v4983_v2 }
 0x2f8   :  { %1952 = vmatpush.msra.mxu2 %v4085_v48  ;;  %2005 = vmatpush.msra.mxu3 %v4129_v29  ;;  %v4981_v48 = vand.u32 4294901760, %v4310_v15  ;;  %v4980_v4 = vand.u32 4294901760, %v4327_v50 }
 0x2f9   :  { %2066 = vmatpush.msrb.mxu0 %v1893_v54  ;;  %2109 = vmatpush.msrb.mxu1 %v4096_v13  ;;  %v4340_v13 = vand.u32 4294901760, %v1405_v47  ;;  %v4358_v54 = vsub.f32 %v1406_v41, %v4329_v1 }
 0x2fa   :  { %1955 = vmatpush.msra.mxu2 %v4099_v62  ;;  %2007 = vmatpush.msra.mxu3 %v4148_v5  ;;  %v4348_v62 = vsub.f32 %v1407_v44, %v4314_v63  ;;  %v2193_v42 = vsub.f32 %v4327_v50, %v4980_v4 }
 0x2fb   :  { %2070 = vmatpush.msrb.mxu0 %v1899_v14  ;;  %2111 = vmatpush.msrb.mxu1 %v4110_v9  ;;  %v2181_v9 = vsub.f32 %v4293_v46, %v4982_v38  ;;  %v4365_v14 = vand.u32 4294901760, %v1404_v57  ;;  %v4374_v61 = vsub.f32 %v1405_v47, %v4340_v13  ;;  %v4977_v33 = vand.u32 4294901760, %v4358_v54 }
 0x2fc   :  { %1958 = vmatpush.msra.mxu2 %v4113_v59  ;;  %2009 = vmatpush.msra.mxu3 %v4154_v53  ;;  %v1403_v59 = vld [vmem:[%s4962_s3 + $0x130] sm:$0xff] }
 0x2fd   :  { %2074 = vmatpush.msrb.mxu0 %v1905_v49  ;;  %2113 = vmatpush.msrb.mxu1 %v4129_v29  ;;  %v2176_v29 = vand.u32 4294901760, %v2175_v37  ;;  %v2187_v49 = vsub.f32 %v4310_v15, %v4981_v48  ;;  %v2182_v26 = vand.u32 4294901760, %v2181_v9  ;;  %v4976_v23 = vand.u32 4294901760, %v4374_v61 }
 0x2fe   :  { %1961 = vmatpush.msra.mxu2 %v4132_v16  ;;  %2011 = vmatpush.msra.mxu3 %v4172_v35  ;;  %v1402_v16 = vld [vmem:[%s4962_s3 + $0x128] sm:$0xff]  ;;  %v2205_v55 = vsub.f32 %v4358_v54, %v4977_v33  ;;  %v4971_v37 = vand.u32 4294901760, %v4442_v6 }
 0x2ff   :  { %2078 = vmatpush.msrb.mxu0 %v1911_v8  ;;  %2115 = vmatpush.msrb.mxu1 %v4148_v5  ;;  %v4978_v8 = vand.u32 4294901760, %v4348_v62  ;;  %v4383_v5 = vand.u32 4294901760, %v1403_v59  ;;  %v4399_v56 = vand.u32 4294901760, %v1402_v16  ;;  %v2211_v25 = vsub.f32 %v4374_v61, %v4976_v23 }
 0x300   :  { %2015 = vmatmul.f32.vlgmr.msra.gmra.mxu3 %v1818_v58  ;;  %1964 = vmatpush.msra.mxu2 %v4152_v20  ;;  %v4397_v20 = vsub.f32 %v1404_v57, %v4365_v14  ;;  %v2194_v58 = vand.u32 4294901760, %v2193_v42  ;;  %v2206_v11 = vand.u32 4294901760, %v2205_v55  ;;  %v1427_v55 = vld [vmem:[%s4962_s3 + $0x1f0] sm:$0xff] }
 0x301   :  { %2171 = vmatpush.msrb.mxu3 %v2170_v40  ;;  %2082 = vmatpush.msrb.mxu0 %v1917_v28  ;;  %v2188_v28 = vand.u32 4294901760, %v2187_v49  ;;  %v4412_v22 = vsub.f32 %v1403_v59, %v4383_v5  ;;  %v4427_v10 = vsub.f32 %v1402_v16, %v4399_v56  ;;  %v2212_v18 = vand.u32 4294901760, %v2211_v25 }
 0x302   :  { %2117 = vmatpush.msrb.mxu1 %v4154_v53  ;;  %2084 = vmatmul.f32.vlgmr.msrb.gmra.mxu0 %v4205_v3  ;;  %v2199_v53 = vsub.f32 %v4348_v62, %v4978_v8  ;;  %v4471_v40 = vand.u32 4294901760, %v1397_v36 }
 0x303   :  { %2177 = vmatpush.msrb.mxu3 %v2176_v29  ;;  %2269 = vmatpush.msra.mxu0 %v4269_v31  ;;  %v4974_v0 = vand.u32 4294901760, %v4412_v22  ;;  %v4972_v41 = vand.u32 4294901760, %v4427_v10 }
 0x304   :  { %1967 = vmatpush.msra.mxu2 %v4161_v24  ;;  %2119 = vmatpush.msrb.mxu1 %v4172_v35  ;;  %v1399_v24 = vld [vmem:[%s4962_s3 + $0x110] sm:$0xff]  ;;  %v4975_v35 = vand.u32 4294901760, %v4397_v20  ;;  %v2200_v19 = vand.u32 4294901760, %v2199_v53  ;;  %v4491_v34 = vsub.f32 %v1397_v36, %v4471_v40 }
 0x305   :  { %2121 = vmatmul.f32.vlgmr.msrb.gmra.mxu1 %v4205_v3  ;;  %2183 = vmatpush.msrb.mxu3 %v2182_v26  ;;  %v4429_v3 = vand.u32 4294901760, %v1400_v45  ;;  %v2229_v59 = vsub.f32 %v4427_v10, %v4972_v41  ;;  %v2235_v26 = vsub.f32 %v4442_v6, %v4971_v37  ;;  %v1421_v41 = vld [vmem:[%s4962_s3 + $0x1c0] sm:$0xff] }
 0x306   :  { %2272 = vmatpush.msra.mxu0 %v4282_v43  ;;  %2322 = vmatpush.msra.mxu1 %v4249_v60  ;;  %v2217_v44 = vsub.f32 %v4397_v20, %v4975_v35  ;;  %v1420_v35 = vld [vmem:[%s4962_s3 + $0x1b8] sm:$0xff]  ;;  %v4609_v33 = vand.u32 4294901760, %v1421_v41 }
 0x307   :  { %1970 = vmatpush.msra.mxu2 %v4175_v21  ;;  %2189 = vmatpush.msrb.mxu3 %v2188_v28  ;;  %v4444_v21 = vand.u32 4294901760, %v1399_v24  ;;  %v4457_v47 = vsub.f32 %v1400_v45, %v4429_v3  ;;  %v1428_v28 = vld [vmem:[%s4962_s3 + $0x1f8] sm:$0xff]  ;;  %v2230_v45 = vand.u32 4294901760, %v2229_v59  ;;  %v4624_v48 = vand.u32 4294901760, %v1420_v35 }
 0x308   :  { %2275 = vmatpush.msra.mxu0 %v4293_v46  ;;  %2324 = vmatpush.msra.mxu1 %v4258_v7  ;;  %v2218_v9 = vand.u32 4294901760, %v2217_v44  ;;  %v4521_v44 = vand.u32 4294901760, %v1427_v55 }
 0x309   :  { %1973 = vmatpush.msra.mxu2 %v4189_v32  ;;  %2195 = vmatpush.msrb.mxu3 %v2194_v58  ;;  %v4459_v32 = vand.u32 4294901760, %v1398_v27  ;;  %v4469_v57 = vsub.f32 %v1399_v24, %v4444_v21  ;;  %v4970_v29 = vand.u32 4294901760, %v4457_v47  ;;  %v2236_v24 = vand.u32 4294901760, %v2235_v26  ;;  %v1425_v26 = vld [vmem:[%s4962_s3 + $0x1e0] sm:$0xff] }
 0x30a   :  { %1976 = vmatmul.f32.vlgmr.msra.gmra.mxu2 %v4208_v39  ;;  %2278 = vmatpush.msra.mxu0 %v4310_v15  ;;  %v2223_v39 = vsub.f32 %v4412_v22, %v4974_v0 }
 0x30b   :  { %2126 = vmatpush.msrb.mxu2 %v4249_v60  ;;  %2326 = vmatpush.msra.mxu1 %v4271_v30  ;;  %v4481_v49 = vsub.f32 %v1398_v27, %v4459_v32  ;;  %v4969_v42 = vand.u32 4294901760, %v4469_v57  ;;  %v2241_v53 = vsub.f32 %v4457_v47, %v4970_v29  ;;  %v4967_v27 = vand.u32 4294901760, %v4491_v34 }
 0x30c   :  { %2201 = vmatpush.msrb.mxu3 %v2200_v19  ;;  %2281 = vmatpush.msra.mxu0 %v4327_v50  ;;  %v2224_v16 = vand.u32 4294901760, %v2223_v39  ;;  %v4513_v19 = vand.u32 4294901760, %v1428_v28  ;;  %v1437_v39 = vld.sshfl [vmem:[#allocation1 + $0x10] sm:$0xff pattern:$0x73625140] }
 0x30d   :  { %2128 = vmatpush.msrb.mxu2 %v4258_v7  ;;  %2328 = vmatpush.msra.mxu1 %v4284_v51  ;;  %v4968_v58 = vand.u32 4294901760, %v4481_v49  ;;  %v2247_v25 = vsub.f32 %v4469_v57, %v4969_v42  ;;  %v2259_v59 = vsub.f32 %v4491_v34, %v4967_v27  ;;  %v4553_v27 = vand.u32 4294901760, %v1425_v26 }
 0x30e   :  { %2207 = vmatpush.msrb.mxu3 %v2206_v11  ;;  %2284 = vmatpush.msra.mxu0 %v4348_v62  ;;  %v2242_v11 = vand.u32 4294901760, %v2241_v53  ;;  %v1424_v53 = vld [vmem:[%s4962_s3 + $0x1d8] sm:$0xff] }
 0x30f   :  { %2130 = vmatpush.msrb.mxu2 %v4271_v30  ;;  %2330 = vmatpush.msra.mxu1 %v4295_v17  ;;  %v2253_v36 = vsub.f32 %v4481_v49, %v4968_v58  ;;  %v1423_v58 = vld [vmem:[%s4962_s3 + $0x1d0] sm:$0xff]  ;;  %v4560_v42 = vand.u32 4294901760, %v1424_v53 }
 0x310   :  { %2213 = vmatpush.msrb.mxu3 %v2212_v18  ;;  %2287 = vmatpush.msra.mxu0 %v4358_v54  ;;  %v1426_v18 = vld [vmem:[%s4962_s3 + $0x1e8] sm:$0xff]  ;;  %v4570_v37 = vand.u32 4294901760, %v1423_v58 }
 0x311   :  { %2132 = vmatpush.msrb.mxu2 %v4284_v51  ;;  %2332 = vmatpush.msra.mxu1 %v4314_v63 }
 0x312   :  { %2219 = vmatpush.msrb.mxu3 %v2218_v9  ;;  %2290 = vmatpush.msra.mxu0 %v4374_v61  ;;  %v2248_v9 = vand.u32 4294901760, %v2247_v25  ;;  %v4549_v25 = vsub.f32 %v1427_v55, %v4521_v44  ;;  %v4601_v0 = vsub.f32 %v1423_v58, %v4570_v37  ;;  %v1419_v58 = vld [vmem:[%s4962_s3 + $0x1b0] sm:$0xff] }
 0x313   :  { %2134 = vmatpush.msrb.mxu2 %v4295_v17  ;;  %2334 = vmatpush.msra.mxu1 %v4329_v1  ;;  %v4639_v52 = vand.u32 4294901760, %v1419_v58 }
 0x314   :  { %2225 = vmatpush.msrb.mxu3 %v2224_v16  ;;  %2293 = vmatpush.msra.mxu0 %v4397_v20  ;;  %v4533_v16 = vsub.f32 %v1428_v28, %v4513_v19  ;;  %v4546_v28 = vand.u32 4294901760, %v1437_v39  ;;  %4993 = vst [vmem:[#allocation7_spill] sm:$0xff] %v4601_v0  ;;  %v4988_v2 = vand.u32 4294901760, %v4601_v0 }
 0x315   :  { %2136 = vmatpush.msrb.mxu2 %v4314_v63  ;;  %2336 = vmatpush.msra.mxu1 %v4340_v13 }
 0x316   :  { %2231 = vmatpush.msrb.mxu3 %v2230_v45  ;;  %2296 = vmatpush.msra.mxu0 %v4412_v22  ;;  %v4540_v45 = vand.u32 4294901760, %v1426_v18  ;;  %v2158_v29 = vsub.f32 %v1437_v39, %v4546_v28 }
 0x317   :  { %2138 = vmatpush.msrb.mxu2 %v4329_v1  ;;  %2338 = vmatpush.msra.mxu1 %v4365_v14 }
 0x318   :  { %2237 = vmatpush.msrb.mxu3 %v2236_v24  ;;  %2299 = vmatpush.msra.mxu0 %v4427_v10  ;;  %v2254_v24 = vand.u32 4294901760, %v2253_v36  ;;  %v4973_v36 = vand.u32 4294901760, %v4533_v16  ;;  %v4565_v55 = vsub.f32 %v1426_v18, %v4540_v45  ;;  %v4578_v18 = vsub.f32 %v1425_v26, %v4553_v27 }
 0x319   :  { %2140 = vmatpush.msrb.mxu2 %v4340_v13  ;;  %2340 = vmatpush.msra.mxu1 %v4383_v5 }
 0x31a   :  { %2243 = vmatpush.msrb.mxu3 %v2242_v11  ;;  %2302 = vmatpush.msra.mxu0 %v4442_v6  ;;  %v2260_v11 = vand.u32 4294901760, %v2259_v59  ;;  %v1422_v59 = vld [vmem:[%s4962_s3 + $0x1c8] sm:$0xff]  ;;  %v2510_v39 = vsub.f32 %v4533_v16, %v4973_v36  ;;  %v4984_v26 = vand.u32 4294901760, %v4565_v55  ;;  %v2159_v36 = vand.u32 4294901760, %v2158_v29 }
 0x31b   :  { %2142 = vmatpush.msrb.mxu2 %v4365_v14  ;;  %2342 = vmatpush.msra.mxu1 %v4399_v56  ;;  %v4986_v23 = vand.u32 4294901760, %v4578_v18 }
 0x31c   :  { %2249 = vmatpush.msrb.mxu3 %v2248_v9  ;;  %2305 = vmatpush.msra.mxu0 %v4457_v47  ;;  %v4979_v9 = vand.u32 4294901760, %v4549_v25  ;;  %v2511_v8 = vand.u32 4294901760, %v2510_v39  ;;  %v2160_v38 = vsub.f32 %v2158_v29, %v2159_v36 }
 0x31d   :  { %2144 = vmatpush.msrb.mxu2 %v4383_v5  ;;  %2344 = vmatpush.msra.mxu1 %v4414_v12 }
 0x31e   :  { %2255 = vmatpush.msrb.mxu3 %v2254_v24  ;;  %2308 = vmatpush.msra.mxu0 %v4469_v57  ;;  %v4585_v24 = vsub.f32 %v1424_v53, %v4560_v42  ;;  %v2516_v53 = vsub.f32 %v4549_v25, %v4979_v9 }
 0x31f   :  { %2146 = vmatpush.msrb.mxu2 %v4399_v56  ;;  %2346 = vmatpush.msra.mxu1 %v4429_v3 }
 0x320   :  { %2261 = vmatpush.msrb.mxu3 %v2260_v11  ;;  %2311 = vmatpush.msra.mxu0 %v4481_v49  ;;  %v4593_v11 = vand.u32 4294901760, %v1422_v59  ;;  %v4987_v9 = vand.u32 4294901760, %v4585_v24  ;;  %v2517_v39 = vand.u32 4294901760, %v2516_v53  ;;  %v4652_v53 = vsub.f32 %v1420_v35, %v4624_v48 }
 0x321   :  { %2148 = vmatpush.msrb.mxu2 %v4414_v12  ;;  %2348 = vmatpush.msra.mxu1 %v4444_v21 }
 0x322   :  { %2263 = vmatmul.f32.vlgmr.msrb.gmra.mxu3 %v4546_v28  ;;  %2314 = vmatpush.msra.mxu0 %v4491_v34  ;;  %v4622_v4 = vsub.f32 %v1422_v59, %v4593_v11  ;;  %v2528_v59 = vsub.f32 %v4578_v18, %v4986_v23  ;;  %4994 = vst [vmem:[#allocation8_spill] sm:$0xff] %v4652_v53 }
 0x323   :  { %2430 = vmatpush.msra.mxu3 %v4249_v60  ;;  %2150 = vmatpush.msrb.mxu2 %v4429_v3  ;;  %v2522_v60 = vsub.f32 %v4565_v55, %v4984_v26  ;;  %v4637_v26 = vsub.f32 %v1421_v41, %v4609_v33  ;;  %v4667_v41 = vsub.f32 %v1419_v58, %v4639_v52 }
 0x324   :  { %2350 = vmatpush.msra.mxu1 %v4459_v32  ;;  %2317 = vmatmul.f32.vlgmr.msra.gmra.mxu0 %v2158_v29  ;;  %v2534_v29 = vsub.f32 %v4585_v24, %v4987_v9  ;;  %v2540_v9 = vsub.f32 %v4601_v0, %v4988_v2  ;;  %v2529_v35 = vand.u32 4294901760, %v2528_v59  ;;  %v1415_v2 = vld [vmem:[%s4962_s3 + $0x190] sm:$0xff]  ;;  %v4995_v0 = vand.u32 4294901760, %v4269_v31 }
 0x325   :  { %2432 = vmatpush.msra.mxu3 %v4258_v7  ;;  %2467 = vmatpush.msrb.mxu0 %v4513_v19  ;;  %v1418_v7 = vld [vmem:[%s4962_s3 + $0x1a8] sm:$0xff]  ;;  %v4997_v31 = vand.u32 4294901760, %v4282_v43  ;;  %v4697_v58 = vand.u32 4294901760, %v1415_v2  ;;  %v4999_v43 = vand.u32 4294901760, %v4293_v46 }
 0x326   :  { %2152 = vmatpush.msrb.mxu2 %v4444_v21  ;;  %2352 = vmatpush.msra.mxu1 %v4471_v40  ;;  %v4654_v23 = vand.u32 4294901760, %v1418_v7 }
 0x327   :  { %2356 = vmatmul.f32.vlgmr.msra.gmra.mxu1 %v2159_v36  ;;  %2434 = vmatpush.msra.mxu3 %v4271_v30  ;;  %v1417_v30 = vld [vmem:[%s4962_s3 + $0x1a0] sm:$0xff]  ;;  %v2523_v36 = vand.u32 4294901760, %v2522_v60 }
 0x328   :  { %2469 = vmatpush.msrb.mxu0 %v4521_v44  ;;  %2512 = vmatpush.msrb.mxu1 %v2511_v8  ;;  %v2161_v8 = vand.u32 4294901760, %v2160_v38  ;;  %v2535_v38 = vand.u32 4294901760, %v2534_v29  ;;  %v4682_v60 = vsub.f32 %v1418_v7, %v4654_v23  ;;  %v2541_v29 = vand.u32 4294901760, %v2540_v9 }
 0x329   :  { %2154 = vmatpush.msrb.mxu2 %v4459_v32  ;;  %2436 = vmatpush.msra.mxu3 %v4284_v51  ;;  %v1416_v51 = vld [vmem:[%s4962_s3 + $0x198] sm:$0xff] }
 0x32a   :  { %2471 = vmatpush.msrb.mxu0 %v4540_v45  ;;  %2518 = vmatpush.msrb.mxu1 %v2517_v39  ;;  %v4669_v39 = vand.u32 4294901760, %v1417_v30 }
 0x32b   :  { %2156 = vmatpush.msrb.mxu2 %v4471_v40  ;;  %2438 = vmatpush.msra.mxu3 %v4295_v17  ;;  %v4996_v17 = vand.u32 4294901760, %v4622_v4 }
 0x32c   :  { %2162 = vmatmul.f32.vlgmr.msrb.gmra.mxu2 %v2161_v8  ;;  %2473 = vmatpush.msrb.mxu0 %v4553_v27  ;;  %v4684_v8 = vand.u32 4294901760, %v1416_v51  ;;  %v4695_v7 = vsub.f32 %v1417_v30, %v4669_v39 }
 0x32d   :  { %2363 = vmatpush.msra.mxu2 %v4995_v0  ;;  %2524 = vmatpush.msrb.mxu1 %v2523_v36  ;;  %v2546_v59 = vsub.f32 %v4622_v4, %v4996_v17  ;;  %v4998_v0 = vand.u32 4294901760, %v4637_v26  ;;  %v1438_v17 = vld.sshfl [vmem:[#allocation1 + $0x18] sm:$0xff pattern:$0x73625140] }
 0x32e   :  { %2440 = vmatpush.msra.mxu3 %v4314_v63  ;;  %2475 = vmatpush.msrb.mxu0 %v4560_v42  ;;  %v1414_v63 = vld [vmem:[%s4962_s3 + $0x188] sm:$0xff] }
 0x32f   :  { %2367 = vmatpush.msra.mxu2 %v4997_v31  ;;  %2530 = vmatpush.msrb.mxu1 %v2529_v35  ;;  %v2552_v36 = vsub.f32 %v4637_v26, %v4998_v0  ;;  %v2547_v9 = vand.u32 4294901760, %v2546_v59  ;;  %v5000_v35 = vand.u32 4294901760, %v4652_v53  ;;  %v4711_v0 = vsub.f32 %v1416_v51, %v4684_v8 }
 0x330   :  { %2442 = vmatpush.msra.mxu3 %v4329_v1  ;;  %2477 = vmatpush.msrb.mxu0 %v4570_v37  ;;  %v1413_v1 = vld [vmem:[%s4962_s3 + $0x180] sm:$0xff]  ;;  %v4718_v46 = vand.u32 4294901760, %v1414_v63  ;;  %v4727_v31 = vsub.f32 %v1415_v2, %v4697_v58 }
 0x331   :  { %2371 = vmatpush.msra.mxu2 %v4999_v43  ;;  %2536 = vmatpush.msrb.mxu1 %v2535_v38  ;;  %v2558_v30 = vsub.f32 %v4652_v53, %v5000_v35  ;;  %v5001_v38 = vand.u32 4294901760, %v4310_v15  ;;  %v2553_v59 = vand.u32 4294901760, %v2552_v36  ;;  %v5002_v43 = vand.u32 4294901760, %v4667_v41 }
 0x332   :  { %2444 = vmatpush.msra.mxu3 %v4340_v13  ;;  %2479 = vmatpush.msrb.mxu0 %v4593_v11  ;;  %v2575_v35 = vand.u32 4294901760, %v4695_v7  ;;  %v4731_v13 = vand.u32 4294901760, %v1413_v1  ;;  %v4733_v53 = vand.u32 4294901760, %v1438_v17  ;;  %v5003_v15 = vand.u32 4294901760, %v4327_v50 }
 0x333   :  { %2375 = vmatpush.msra.mxu2 %v5001_v38  ;;  %2542 = vmatpush.msrb.mxu1 %v2541_v29  ;;  %v2564_v51 = vsub.f32 %v4667_v41, %v5002_v43  ;;  %v2559_v29 = vand.u32 4294901760, %v2558_v30  ;;  %v5004_v36 = vand.u32 4294901760, %v4682_v60  ;;  %v2581_v2 = vand.u32 4294901760, %v4711_v0 }
 0x334   :  { %2446 = vmatpush.msra.mxu3 %v4365_v14  ;;  %2481 = vmatpush.msrb.mxu0 %v4609_v33  ;;  %v4744_v14 = vsub.f32 %v1414_v63, %v4718_v46  ;;  %v5005_v43 = vand.u32 4294901760, %v4348_v62  ;;  %v2587_v30 = vand.u32 4294901760, %v4727_v31  ;;  %v4758_v63 = vsub.f32 %v1413_v1, %v4731_v13 }
 0x335   :  { %2379 = vmatpush.msra.mxu2 %v5003_v15  ;;  %2548 = vmatpush.msrb.mxu1 %v2547_v9  ;;  %v2570_v38 = vsub.f32 %v4682_v60, %v5004_v36  ;;  %v2565_v50 = vand.u32 4294901760, %v2564_v51  ;;  %v2576_v9 = vsub.f32 %v4695_v7, %v2575_v35  ;;  %v5006_v62 = vand.u32 4294901760, %v4358_v54 }
 0x336   :  { %2448 = vmatpush.msra.mxu3 %v4383_v5  ;;  %2483 = vmatpush.msrb.mxu0 %v4624_v48  ;;  %v4755_v5 = vsub.f32 %v1438_v17, %v4733_v53  ;;  %v2582_v51 = vsub.f32 %v4711_v0, %v2581_v2  ;;  %v5007_v17 = vand.u32 4294901760, %v4374_v61  ;;  %v2588_v54 = vsub.f32 %v4727_v31, %v2587_v30 }
 0x337   :  { %2383 = vmatpush.msra.mxu2 %v5005_v43  ;;  %2554 = vmatpush.msrb.mxu1 %v2553_v59  ;;  %v2571_v59 = vand.u32 4294901760, %v2570_v38  ;;  %v2577_v1 = vand.u32 4294901760, %v2576_v9  ;;  %v5010_v43 = vand.u32 4294901760, %v4427_v10  ;;  %v5012_v10 = vand.u32 4294901760, %v4457_v47 }
 0x338   :  { %2450 = vmatpush.msra.mxu3 %v4399_v56  ;;  %2485 = vmatpush.msrb.mxu0 %v4639_v52  ;;  %v2593_v56 = vand.u32 4294901760, %v4744_v14  ;;  %v2500_v15 = vand.u32 4294901760, %v4755_v5  ;;  %v2583_v61 = vand.u32 4294901760, %v2582_v51  ;;  %v2589_v38 = vand.u32 4294901760, %v2588_v54  ;;  %v2809_v54 = vld [vmem:[%s4964_s5 + $0x8] sm:$0xff] }
 0x339   :  { %2387 = vmatpush.msra.mxu2 %v5006_v62  ;;  %2560 = vmatpush.msrb.mxu1 %v2559_v29  ;;  %v5008_v29 = vand.u32 4294901760, %v4397_v20  ;;  %v5015_v62 = vand.u32 4294901760, %v4549_v25  ;;  %v5016_v47 = vand.u32 4294901760, %v4481_v49  ;;  %v5019_v51 = vand.u32 4294901760, %v4578_v18 }
 0x33a   :  { %2452 = vmatpush.msra.mxu3 %v4414_v12  ;;  %2487 = vmatpush.msrb.mxu0 %v4654_v23  ;;  %v2599_v12 = vand.u32 4294901760, %v4758_v63  ;;  %v2594_v36 = vsub.f32 %v4744_v14, %v2593_v56  ;;  %v2501_v20 = vsub.f32 %v4755_v5, %v2500_v15  ;;  %v5020_v49 = vand.u32 4294901760, %v4585_v24 }
 0x33b   :  { %2391 = vmatpush.msra.mxu2 %v5007_v17  ;;  %2566 = vmatpush.msrb.mxu1 %v2565_v50 }
 0x33c   :  { %2454 = vmatpush.msra.mxu3 %v4429_v3  ;;  %2489 = vmatpush.msrb.mxu0 %v4669_v39  ;;  %v5009_v3 = vand.u32 4294901760, %v4412_v22  ;;  %v2595_v22 = vand.u32 4294901760, %v2594_v36  ;;  %v2502_v50 = vand.u32 4294901760, %v2501_v20 }
 0x33d   :  { %2395 = vmatpush.msra.mxu2 %v5008_v29  ;;  %2572 = vmatpush.msrb.mxu1 %v2571_v59  ;;  %v5017_v59 = vand.u32 4294901760, %v4565_v55  ;;  %v4921_v29 = vand.u32 4294901760, %v2809_v54 }
 0x33e   :  { %2456 = vmatpush.msra.mxu3 %v4444_v21  ;;  %2491 = vmatpush.msrb.mxu0 %v4684_v8  ;;  %v2600_v21 = vsub.f32 %v4758_v63, %v2599_v12 }
 0x33f   :  { %2399 = vmatpush.msra.mxu2 %v5009_v3  ;;  %2578 = vmatpush.msrb.mxu1 %v2577_v1  ;;  %v4932_v20 = vsub.f32 %v2809_v54, %v4921_v29 }
 0x340   :  { %2458 = vmatpush.msra.mxu3 %v4459_v32  ;;  %2493 = vmatpush.msrb.mxu0 %v4697_v58  ;;  %v5011_v32 = vand.u32 4294901760, %v4442_v6  ;;  %v2601_v9 = vand.u32 4294901760, %v2600_v21  ;;  %v5014_v6 = vand.u32 4294901760, %v4469_v57  ;;  %v5018_v57 = vand.u32 4294901760, %v4491_v34  ;;  %v5021_v34 = vld [vmem:[#allocation7_spill] sm:$0xff] }
 0x341   :  { %2403 = vmatpush.msra.mxu2 %v5010_v43  ;;  %2584 = vmatpush.msrb.mxu1 %v2583_v61  ;;  %v2808_v61 = vld [vmem:[%s4964_s5] sm:$0xff] }
 0x342   :  { %2460 = vmatpush.msra.mxu3 %v4471_v40  ;;  %2495 = vmatpush.msrb.mxu0 %v4718_v46  ;;  %v5013_v40 = vand.u32 4294901760, %v4533_v16  ;;  %v2838_v21 = vand.u32 4294901760, %v2808_v61 }
 0x343   :  { %2407 = vmatpush.msra.mxu2 %v5011_v32  ;;  %2590 = vmatpush.msrb.mxu1 %v2589_v38 }
 0x344   :  { %2462 = vmatmul.f32.vlgmr.msra.gmra.mxu3 %v4546_v28  ;;  %2497 = vmatpush.msrb.mxu0 %v4731_v13 }
 0x345   :  { %2663 = vmatpush.msrb.mxu3 %v4513_v19  ;;  %2411 = vmatpush.msra.mxu2 %v5012_v10 }
 0x346   :  { %2596 = vmatpush.msrb.mxu1 %v2595_v22  ;;  %2503 = vmatmul.f32.vlgmr.msrb.gmra.mxu0 %v2502_v50  ;;  %v2875_v50 = vand.u32 4294901760, %v4932_v20 }
 0x347   :  { %2665 = vmatpush.msrb.mxu3 %v4521_v44  ;;  %2704 = vmatpush.msra.mxu0 %v5013_v40 }
 0x348   :  { %2415 = vmatpush.msra.mxu2 %v5014_v6  ;;  %2602 = vmatpush.msrb.mxu1 %v2601_v9  ;;  %v2880_v9 = vsub.f32 %v2808_v61, %v2838_v21  ;;  %v2876_v6 = vsub.f32 %v4932_v20, %v2875_v50 }
 0x349   :  { %2604 = vmatmul.f32.vlgmr.msrb.gmra.mxu1 %v4733_v53  ;;  %2667 = vmatpush.msrb.mxu3 %v4540_v45 }
 0x34a   :  { %2708 = vmatpush.msra.mxu0 %v5015_v62  ;;  %2771 = vmatpush.msra.mxu1 %v4513_v19  ;;  %v5022_v19 = vand.u32 4294901760, %v5021_v34  ;;  %v2881_v62 = vand.u32 4294901760, %v2880_v9 }
 0x34b   :  { %2419 = vmatpush.msra.mxu2 %v5016_v47  ;;  %2669 = vmatpush.msrb.mxu3 %v4553_v27 }
 0x34c   :  { %2712 = vmatpush.msra.mxu0 %v5017_v59  ;;  %2773 = vmatpush.msra.mxu1 %v4521_v44  ;;  %v5023_v44 = vand.u32 4294901760, %v4622_v4  ;;  %v2877_v59 = vand.u32 4294901760, %v2876_v6 }
 0x34d   :  { %2423 = vmatpush.msra.mxu2 %v5018_v57  ;;  %2671 = vmatpush.msrb.mxu3 %v4560_v42  ;;  %v2882_v57 = vsub.f32 %v2880_v9, %v2881_v62 }
 0x34e   :  { %2425 = vmatmul.f32.vlgmr.msra.gmra.mxu2 %v4546_v28  ;;  %2716 = vmatpush.msra.mxu0 %v5019_v51 }
 0x34f   :  { %2610 = vmatpush.msrb.mxu2 %v4533_v16  ;;  %2775 = vmatpush.msra.mxu1 %v4540_v45  ;;  %v5028_v45 = vand.u32 4294901760, %v4682_v60 }
 0x350   :  { %2673 = vmatpush.msrb.mxu3 %v4570_v37  ;;  %2720 = vmatpush.msra.mxu0 %v5020_v49 }
 0x351   :  { %2613 = vmatpush.msrb.mxu2 %v4549_v25  ;;  %2777 = vmatpush.msra.mxu1 %v4553_v27  ;;  %v5024_v27 = vand.u32 4294901760, %v4637_v26 }
 0x352   :  { %2675 = vmatpush.msrb.mxu3 %v4593_v11  ;;  %2724 = vmatpush.msra.mxu0 %v5022_v19 }
 0x353   :  { %2616 = vmatpush.msrb.mxu2 %v4565_v55  ;;  %2779 = vmatpush.msra.mxu1 %v4560_v42  ;;  %v5025_v42 = vld [vmem:[#allocation8_spill] sm:$0xff] }
 0x354   :  { %2677 = vmatpush.msrb.mxu3 %v4609_v33  ;;  %2728 = vmatpush.msra.mxu0 %v5023_v44  ;;  %v5026_v16 = vand.u32 4294901760, %v5025_v42 }
 0x355   :  { %2619 = vmatpush.msrb.mxu2 %v4578_v18  ;;  %2781 = vmatpush.msra.mxu1 %v4570_v37  ;;  %v5027_v37 = vand.u32 4294901760, %v4667_v41 }
 0x356   :  { %2679 = vmatpush.msrb.mxu3 %v4624_v48  ;;  %2732 = vmatpush.msra.mxu0 %v5024_v27 }
 0x357   :  { %2622 = vmatpush.msrb.mxu2 %v4585_v24  ;;  %2783 = vmatpush.msra.mxu1 %v4593_v11 }
 0x358   :  { %2681 = vmatpush.msrb.mxu3 %v4639_v52  ;;  %2736 = vmatpush.msra.mxu0 %v5026_v16 }
 0x359   :  { %2625 = vmatpush.msrb.mxu2 %v5021_v34  ;;  %2785 = vmatpush.msra.mxu1 %v4609_v33  ;;  %v2883_v34 = vand.u32 4294901760, %v2882_v57 }
 0x35a   :  { %2683 = vmatpush.msrb.mxu3 %v4654_v23  ;;  %2740 = vmatpush.msra.mxu0 %v5027_v37 }
 0x35b   :  { %2628 = vmatpush.msrb.mxu2 %v4622_v4  ;;  %2787 = vmatpush.msra.mxu1 %v4624_v48 }
 0x35c   :  { %2685 = vmatpush.msrb.mxu3 %v4669_v39  ;;  %2744 = vmatpush.msra.mxu0 %v5028_v45  ;;  %v1636_v28 = vpop.f32.mrf.mxu0 }
 0x35d   :  { %2631 = vmatpush.msrb.mxu2 %v4637_v26  ;;  %2789 = vmatpush.msra.mxu1 %v4639_v52  ;;  %v3046_v52 = vld [vmem:[%s4963_s4] ss:$0 sm:$0xff] }
 0x35e   :  { %2687 = vmatpush.msrb.mxu3 %v4684_v8  ;;  %2748 = vmatpush.msra.mxu0 %v2575_v35  ;;  %v1675_v55 = vpop.f32.mrf.mxu1 }
 0x35f   :  { %2634 = vmatpush.msrb.mxu2 %v5025_v42  ;;  %2791 = vmatpush.msra.mxu1 %v4654_v23 }
 0x360   :  { %2689 = vmatpush.msrb.mxu3 %v4697_v58  ;;  %2752 = vmatpush.msra.mxu0 %v2581_v2  ;;  %v1582_v33 = vpop.f32.mrf.mxu3 }
 0x361   :  { %2637 = vmatpush.msrb.mxu2 %v4667_v41  ;;  %2793 = vmatpush.msra.mxu1 %v4669_v39 }
 0x362   :  { %2691 = vmatpush.msrb.mxu3 %v4718_v46  ;;  %2756 = vmatpush.msra.mxu0 %v2587_v30 }
 0x363   :  { %2640 = vmatpush.msrb.mxu2 %v4682_v60  ;;  %2795 = vmatpush.msra.mxu1 %v4684_v8 }
 0x364   :  { %2693 = vmatpush.msrb.mxu3 %v4731_v13  ;;  %2760 = vmatpush.msra.mxu0 %v2593_v56 }
 0x365   :  { %2643 = vmatpush.msrb.mxu2 %v4695_v7  ;;  %2797 = vmatpush.msra.mxu1 %v4697_v58 }
 0x366   :  { %2697 = vmatmul.f32.vlgmr.msrb.gmra.mxu3 %v2500_v15  ;;  %2764 = vmatpush.msra.mxu0 %v2599_v12 }
 0x367   :  { %2646 = vmatpush.msrb.mxu2 %v4711_v0  ;;  %2799 = vmatpush.msra.mxu1 %v4718_v46 }
 0x368   :  { %2766 = vmatmul.f32.vlgmr.msra.gmra.mxu0 %v4733_v53  ;;  %v1481_v48 = vpop.f32.mrf.mxu2  ;;  %v1923_v39 = vpop.f32.mrf.mxu1 }
 0x369   :  { %2649 = vmatpush.msrb.mxu2 %v4727_v31  ;;  %2801 = vmatpush.msra.mxu1 %v4731_v13  ;;  %v1482_v4 = vadd.f32 %v3046_v52, %v1481_v48  ;;  %v1781_v11 = vpop.f32.mrf.mxu3  ;;  %v2811_v13 = vld [vmem:[%s4964_s5 + $0x18] sm:$0xff] }
 0x36a   :  { %2803 = vmatmul.f32.vlgmr.msra.gmra.mxu1 %v4733_v53  ;;  %v1822_v53 = vpop.f32.mrf.mxu0  ;;  %v4903_v30 = vand.u32 4294901760, %v2811_v13 }
 0x36b   :  { %2652 = vmatpush.msrb.mxu2 %v4744_v14  ;;  %v1583_v23 = vadd.f32 %v1582_v33, %v1482_v4 }
 0x36c   :  { %v4909_v56 = vsub.f32 %v2811_v13, %v4903_v30 }
 0x36d   :  { %2655 = vmatpush.msrb.mxu2 %v4758_v63  ;;  %v1637_v25 = vadd.f32 %v1636_v28, %v1583_v23  ;;  %v2810_v63 = vld [vmem:[%s4964_s5 + $0x10] sm:$0xff] }
 0x36e   :  { %2658 = vmatmul.f32.vlgmr.msrb.gmra.mxu2 %v4755_v5  ;;  %v4911_v17 = vand.u32 4294901760, %v2810_v63  ;;  %v2863_v15 = vand.u32 4294901760, %v4909_v56 }
 0x36f   :  { %v1676_v18 = vadd.f32 %v1675_v55, %v1637_v25  ;;  %2833 = vmatpush.msra.mxu2 %v4903_v30 }
 0x370   :  { %v4919_v12 = vsub.f32 %v2810_v63, %v4911_v17  ;;  %v2864_v3 = vsub.f32 %v4909_v56, %v2863_v15 }
 0x371   :  { %2835 = vmatpush.msra.mxu2 %v4911_v17 }
 0x372   :  { %v1744_v24 = vpop.f32.mrf.mxu2  ;;  %v2869_v38 = vand.u32 4294901760, %v4919_v12  ;;  %v2865_v22 = vand.u32 4294901760, %v2864_v3 }
 0x373   :  { %v1745_v26 = vadd.f32 %v1744_v24, %v1676_v18  ;;  %2837 = vmatpush.msra.mxu2 %v4921_v29 }
 0x374   :  { %v2870_v32 = vsub.f32 %v4919_v12, %v2869_v38  ;;  %2866 = vmatpush.msra.mxu3 %v2865_v22 }
 0x375   :  { %v1782_v41 = vadd.f32 %v1781_v11, %v1745_v26  ;;  %2839 = vmatpush.msra.mxu2 %v2838_v21 }
 0x376   :  { %v2871_v40 = vand.u32 4294901760, %v2870_v32 }
 0x377   :  { %v1823_v60 = vadd.f32 %v1822_v53, %v1782_v41  ;;  %2904 = vmatpush.msrb.mxu2 %v4909_v56 }
 0x378   :  { %2872 = vmatpush.msra.mxu3 %v2871_v40 }
 0x379   :  { %v1924_v8 = vadd.f32 %v1923_v39, %v1823_v60  ;;  %2907 = vmatpush.msrb.mxu2 %v4919_v12 }
 0x37a   :  { %2878 = vmatpush.msra.mxu3 %v2877_v59 }
 0x37b   :  { %2910 = vmatpush.msrb.mxu2 %v4932_v20 }
 0x37c   :  { %2884 = vmatpush.msra.mxu3 %v2883_v34 }
 0x37d   :  { %2913 = vmatpush.msrb.mxu2 %v2880_v9 }
 0x37e   :  { %2933 = vmatpush.msrb.mxu3 %v4903_v30 }
 0x37f   :  { %v2085_v46 = vpop.f32.mrf.mxu0 }
 0x380   :  { %2935 = vmatpush.msrb.mxu3 %v4911_v17 }
 0x382   :  { %v2122_v2 = vpop.f32.mrf.mxu1  ;;  %2937 = vmatpush.msrb.mxu3 %v4921_v29 }
 0x383   :  { %v2016_v31 = vpop.f32.mrf.mxu3 }
 0x384   :  { %2939 = vmatpush.msrb.mxu3 %v2838_v21 }
 0x38d   :  { %v1977_v58 = vpop.f32.mrf.mxu2 }
 0x38e   :  { %v1978_v7 = vadd.f32 %v1977_v58, %v1924_v8 }
 0x390   :  { %v2017_v0 = vadd.f32 %v2016_v31, %v1978_v7  ;;  %v3047_v7 = vld [vmem:[%s4965_s6] ss:$0 sm:$0xff] }
 0x392   :  { %v2086_v35 = vadd.f32 %v2085_v46, %v2017_v0 }
 0x394   :  { %v2123_v5 = vadd.f32 %v2122_v2, %v2086_v35 }
 0x3a1   :  { %v2318_v10 = vpop.f32.mrf.mxu0 }
 0x3a4   :  { %v2357_v51 = vpop.f32.mrf.mxu1 }
 0x3a5   :  { %v2264_v36 = vpop.f32.mrf.mxu3 }
 0x3af   :  { %v2163_v14 = vpop.f32.mrf.mxu2 }
 0x3b0   :  { %v2164_v1 = vadd.f32 %v2163_v14, %v2123_v5 }
 0x3b2   :  { %v2265_v43 = vadd.f32 %v2264_v36, %v2164_v1 }
 0x3b4   :  { %v2319_v47 = vadd.f32 %v2318_v10, %v2265_v43 }
 0x3b6   :  { %v2358_v19 = vadd.f32 %v2357_v51, %v2319_v47 }
 0x3c3   :  { %v2504_v16 = vpop.f32.mrf.mxu0 }
 0x3c6   :  { %v2605_v45 = vpop.f32.mrf.mxu1 }
 0x3c7   :  { %v2463_v27 = vpop.f32.mrf.mxu3 }
 0x3d1   :  { %v2426_v49 = vpop.f32.mrf.mxu2 }
 0x3d2   :  { %v2427_v44 = vadd.f32 %v2426_v49, %v2358_v19 }
 0x3d4   :  { %v2464_v42 = vadd.f32 %v2463_v27, %v2427_v44 }
 0x3d6   :  { %v2505_v37 = vadd.f32 %v2504_v16, %v2464_v42 }
 0x3d8   :  { %v2606_v52 = vadd.f32 %v2605_v45, %v2505_v37 }
 0x3e5   :  { %v2767_v28 = vpop.f32.mrf.mxu0 }
 0x3e7   :  { %v2804_v55 = vpop.f32.mrf.mxu1 }
 0x3e9   :  { %v2698_v33 = vpop.f32.mrf.mxu3 }
 0x3f1   :  { %v2659_v48 = vpop.f32.mrf.mxu2 }
 0x3f2   :  { %v2660_v4 = vadd.f32 %v2659_v48, %v2606_v52 }
 0x3f4   :  { %v2699_v23 = vadd.f32 %v2698_v33, %v2660_v4 }
 0x3f6   :  { %v2768_v25 = vadd.f32 %v2767_v28, %v2699_v23 }
 0x3f8   :  { %v2805_v18 = vadd.f32 %v2804_v55, %v2768_v25 }
 0x3fa   :  { %3048 = vtanh.f32 %v2805_v18 }
 0x400   :  { %v3049_v24 = vpop.eup %3048 }
 0x401   :  { %v2818_v26 = vsel %vm2816_vm11, %v3049_v24, 0 }
 0x402   :  { %v2840_v11 = vand.u32 4294901760, %v2818_v26 }
 0x404   :  { %v2841_v41 = vsub.f32 %v2818_v26, %v2840_v11  ;;  %2886 = vmatmul.f32.vlgmr.msra.gmra.mxu3 %v2840_v11 }
 0x405   :  { %2993 = vmatpush.msra.mxu3 %v4903_v30 }
 0x406   :  { %v2842_v53 = vand.u32 4294901760, %v2841_v41 }
 0x407   :  { %2995 = vmatpush.msra.mxu3 %v4911_v17 }
 0x408   :  { %v2843_v60 = vsub.f32 %v2841_v41, %v2842_v53 }
 0x409   :  { %2997 = vmatpush.msra.mxu3 %v4921_v29 }
 0x40a   :  { %v2844_v39 = vand.u32 4294901760, %v2843_v60 }
 0x40b   :  { %2999 = vmatpush.msra.mxu3 %v2838_v21 }
 0x40c   :  { %2845 = vmatmul.f32.vlgmr.msra.gmra.mxu2 %v2844_v39  ;;  %2943 = vmatmul.f32.vlgmr.msrb.gmra.mxu3 %v2842_v53 }
 0x40d   :  { %2962 = vmatpush.msra.mxu2 %v2863_v15 }
 0x40f   :  { %2966 = vmatpush.msra.mxu2 %v2869_v38 }
 0x411   :  { %2970 = vmatpush.msra.mxu2 %v2875_v50 }
 0x413   :  { %2974 = vmatpush.msra.mxu2 %v2881_v62 }
 0x414   :  { %2916 = vmatmul.f32.vlgmr.msrb.gmra.mxu2 %v2841_v41  ;;  %3001 = vmatmul.f32.vlgmr.msra.gmra.mxu3 %v2840_v11 }
 0x41c   :  { %2976 = vmatmul.f32.vlgmr.msra.gmra.mxu2 %v2840_v11 }
 0x487   :  { %v2887_v58 = vpop.f32.mrf.mxu3 }
 0x48f   :  { %v2846_v8 = vpop.f32.mrf.mxu2  ;;  %v2944_v0 = vpop.f32.mrf.mxu3 }
 0x490   :  { %v2847_v31 = vadd.f32 %v3047_v7, %v2846_v8 }
 0x492   :  { %v2888_v35 = vadd.f32 %v2887_v58, %v2847_v31 }
 0x497   :  { %v2917_v46 = vpop.f32.mrf.mxu2  ;;  %v3002_v5 = vpop.f32.mrf.mxu3 }
 0x498   :  { %v2918_v13 = vadd.f32 %v2917_v46, %v2888_v35 }
 0x49a   :  { %v2945_v2 = vadd.f32 %v2944_v0, %v2918_v13 }
 0x49f   :  { %v2977_v14 = vpop.f32.mrf.mxu2 }
 0x4a0   :  { %v2978_v30 = vadd.f32 %v2977_v14, %v2945_v2 }
 0x4a2   :  { %v3003_v63 = vadd.f32 %v3002_v5, %v2978_v30 }
 0x4a4   :  { %3006 = vst.msk [vmem:[#allocation4] sm:$0x3] %vm3005_vm12, %v3003_v63 }
 0x4a5   :  { %3017 = dma.vmem_to_hbm [thread:$0]  %s3013_s22, 32, %s3015_s25, [#allocation5]  }
 0x4a6   :  { %3074 = dma.done.wait [#allocation5], 32  }
 0x4a7   :  { %3075 = vsyncadd [#allocation5], 4294967264 }
 0x4a8   :  { %3022 = vsyncpa [#allocation5], 1 }

</bundles_post_ra>
